<compile_context>
chip_gen: v7x
topology: tpu7x:2x2x1
jax: 0.10.0
libtpu: 0.0.40
codegen_flags: <defaults>
</compile_context>

<pallas_src>
import functools

import jax
import jax.numpy as jnp
from jax.experimental import pallas as pl
from jax.experimental.pallas import tpu as pltpu

BN_EPS = 1e-5
LRELU_SLOPE = 0.01            # PyTorch F.leaky_relu default negative_slope
LANE = 128
MEGACORE_SPLIT_ROWS = 512     # split batch into >=2 blocks on v7x once it reaches 2x this


def _round_up(n, m):
    return ((n + m - 1) // m) * m


def _vmem_plan():
    """(max_batch_block, vmem_limit_bytes, split_for_megacore) chosen per TPU generation."""
    try:
        cap = getattr(pltpu.get_tpu_info(), "vmem_capacity_bytes", None)
    except Exception:
        cap = None
    if cap is None:
        return 1024, 40 << 20, False          # conservative: safe on every generation
    if cap <= (80 << 20):                     # v7x-class: 64 MiB VMEM, 2 TCs / chip
        return 1024, 44 << 20, True
    return 2048, 96 << 20, False              # v5e / v6e: 128 MiB physical VMEM


def _mm(h, w_ref):
    """MXU matmul: activations cast to the stored weight dtype (bf16), f32 accumulation."""
    return jnp.dot(h.astype(w_ref.dtype), w_ref[...], preferred_element_type=jnp.float32)


def _bn_lrelu(h, g_ref, b_ref, inv_n, valid, out_dtype):
    """Training-mode BatchNorm1d (biased var, eps=1e-5) folded to scale/shift + leaky ReLU.

    `valid` (or None) masks padded batch rows out of the statistics; `inv_n` = 1 / (#valid).
    Result is cast to `out_dtype` (the matmul dtype of the next layer).
    """
    hm = h if valid is None else h * valid
    mean = jnp.sum(hm, axis=0, keepdims=True) * inv_n
    ex2 = jnp.sum(hm * hm, axis=0, keepdims=True) * inv_n
    var = ex2 - mean * mean                                # biased (training-mode) variance
    scale = g_ref[...] * jax.lax.rsqrt(var + BN_EPS)
    shift = b_ref[...] - mean * scale
    y = h * scale + shift
    return jnp.maximum(y, LRELU_SLOPE * y).astype(out_dtype)


def vade_kernel(block_b, needs_mask, *refs):
    if needs_mask:
        nvalid_ref, refs = refs[0], refs[1:]   # scalar prefetch (SMEM): [# valid batch rows]
    (x_ref, eps_ref,
     w_e1, g_e1, be_e1,
     w_e2, g_e2, be_e2,
     w_e3, g_e3, be_e3,
     w_head, b_head,
     w_d1, g_d1, be_d1,
     w_d2, g_d2, be_d2,
     w_d3, g_d3, be_d3,
     w_d4, b_d4,
     out_ref) = refs

    zp = eps_ref.shape[1]          # 128-padded latent width
    xp = w_d4.shape[1]             # 128-padded input width
    act_dt = w_e1.dtype            # inter-layer activation dtype (matmul dtype)

    if needs_mask:
        cnt = jnp.minimum(nvalid_ref[0] - pl.program_id(0) * block_b, block_b)
        inv_n = 1.0 / cnt.astype(jnp.float32)
        rows = jax.lax.broadcasted_iota(jnp.int32, (block_b, 1), 0)
        valid = (rows < cnt).astype(jnp.float32)
    else:
        inv_n = 1.0 / float(block_b)
        valid = None

    # ---- encoder ----
    h = _bn_lrelu(_mm(x_ref[...], w_e1), g_e1, be_e1, inv_n, valid, act_dt)
    h = _bn_lrelu(_mm(h, w_e2), g_e2, be_e2, inv_n, valid, act_dt)
    h = _bn_lrelu(_mm(h, w_e3), g_e3, be_e3, inv_n, valid, act_dt)

    # ---- fused mu | log_var head (zero-padded to 128-lane sections; padded lanes stay 0) ----
    head = _mm(h, w_head) + b_head[...]
    mu_p = head[:, :zp]
    lv_p = head[:, zp:]

    # ---- reparameterize: z = mu + eps * exp(log_var / 2) ----
    # eps is zero in padded lanes, so padded lanes of z stay 0 + 0 * exp(0/2) = 0.
    z_p = mu_p + eps_ref[...] * jnp.exp(0.5 * lv_p)

    # ---- decoder (w_d1 rows beyond z_dim are zero -> padded z lanes are inert) ----
    d = _bn_lrelu(_mm(z_p, w_d1), g_d1, be_d1, inv_n, valid, act_dt)
    d = _bn_lrelu(_mm(d, w_d2), g_d2, be_d2, inv_n, valid, act_dt)
    d = _bn_lrelu(_mm(d, w_d3), g_d3, be_d3, inv_n, valid, act_dt)
    xh_p = jnp.tanh(_mm(d, w_d4) + b_d4[...])

    # ---- direct 128-aligned slab stores: [mu | log_var | z | x_hat] ----
    out_ref[:, 0 * zp:1 * zp] = mu_p
    out_ref[:, 1 * zp:2 * zp] = lv_p
    out_ref[:, 2 * zp:3 * zp] = z_p
    out_ref[:, 3 * zp:3 * zp + xp] = xh_p


def init_params(key, in_dim, z_dim):
    """PyTorch-default init.  Linear weights stored pre-transposed as (in, out)."""
    layers = [
        ("enc1", in_dim, 512, True),
        ("enc2", 512, 256, True),
        ("enc3", 256, 128, True),
        ("mu", 128, z_dim, False),
        ("log_var", 128, z_dim, False),
        ("dec1", z_dim, 128, True),
        ("dec2", 128, 256, True),
        ("dec3", 256, 512, True),
        ("dec4", 512, in_dim, False),
    ]
    p = {}
    for name, din, dout, has_bn in layers:
        key, kw, kb = jax.random.split(key, 3)
        bound = 1.0 / float(din) ** 0.5
        p[f"{name}_w"] = jax.random.uniform(kw, (din, dout), jnp.float32, -bound, bound)
        p[f"{name}_b"] = jax.random.uniform(kb, (1, dout), jnp.float32, -bound, bound)
        if has_bn:
            p[f"{name}_bn_g"] = jnp.ones((1, dout), jnp.float32)   # BatchNorm weight = 1
            p[f"{name}_bn_b"] = jnp.zeros((1, dout), jnp.float32)  # BatchNorm bias = 0
    # NOTE: pi_prior / mu_prior / log_var_prior only enter compute_loss, not forward().
    return p


def pack_params(p, in_dim, z_dim, matmul_dtype=jnp.bfloat16):
    """Convert PyTorch-layout params to the kernel layout.

    * Pre-BN linear biases are dropped (exact: batch-mean subtraction cancels them).
    * mu / log_var are fused into one 2*zp-wide head; mu/log_var/dec1/dec4 zero-padded to
      128-lane multiples.
    * Matmul weights cast to `matmul_dtype` (bf16 for MXU throughput; pass jnp.float32 for
      closer numerical parity with the fp32 PyTorch reference).
    """
    zp = _round_up(z_dim, LANE)
    xp = _round_up(in_dim, LANE)

    def pad2(a, rows, cols):
        out = jnp.zeros((rows, cols), a.dtype)
        return out.at[: a.shape[0], : a.shape[1]].set(a)

    w_head = jnp.concatenate(
        [pad2(p["mu_w"], 128, zp), pad2(p["log_var_w"], 128, zp)], axis=1)
    b_head = jnp.concatenate(
        [pad2(p["mu_b"], 1, zp), pad2(p["log_var_b"], 1, zp)], axis=1)

    out = []
    for name in ("enc1", "enc2", "enc3"):
        out += [p[f"{name}_w"].astype(matmul_dtype), p[f"{name}_bn_g"], p[f"{name}_bn_b"]]
    out += [w_head.astype(matmul_dtype), b_head]
    out += [pad2(p["dec1_w"], zp, 128).astype(matmul_dtype), p["dec1_bn_g"], p["dec1_bn_b"]]
    for name in ("dec2", "dec3"):
        out += [p[f"{name}_w"].astype(matmul_dtype), p[f"{name}_bn_g"], p[f"{name}_bn_b"]]
    out += [pad2(p["dec4_w"], 512, xp).astype(matmul_dtype), pad2(p["dec4_b"], 1, xp)]
    return tuple(out)


@jax.jit
def vade_forward(x, eps, packed_params):
    batch, in_dim = x.shape
    z_dim = eps.shape[1]
    zp = _round_up(z_dim, LANE)
    xp = _round_up(in_dim, LANE)
    out_w = 3 * zp + xp

    max_block, vmem_limit, split_megacore = _vmem_plan()

    # Batch block: whole (8-row padded) batch if it fits, else tile at max_block.
    pb8 = _round_up(batch, 8)
    block_b = min(pb8, max_block)
    # v7x megacore: make sure the "parallel" batch axis has >= 2 steps once batch is large.
    if split_megacore and pb8 >= 2 * MEGACORE_SPLIT_ROWS and block_b == pb8:
        block_b = _round_up((pb8 + 1) // 2, 8)
    padded_batch = _round_up(batch, block_b)
    grid = (padded_batch // block_b,)
    needs_mask = padded_batch != batch
    # TODO(synk): when grid > 1, BatchNorm statistics are per batch block rather than over the
    # full batch (PyTorch training mode); exact batch-wide stats would need a two-pass scheme.

    x_p = x
    if needs_mask:
        x_p = jnp.zeros((padded_batch, in_dim), x.dtype).at[:batch].set(x)
    eps_p = jnp.zeros((padded_batch, zp), jnp.float32).at[:batch, :z_dim].set(eps)

    if needs_mask:
        row_map = lambda i, nv: (i, 0)     # batch-tiled arrays
        const_map = lambda i, nv: (0, 0)   # weights: VMEM-resident across all batch tiles
    else:
        row_map = lambda i: (i, 0)
        const_map = lambda i: (0, 0)

    in_specs = [
        pl.BlockSpec((block_b, in_dim), row_map),
        pl.BlockSpec((block_b, zp), row_map),
    ] + [pl.BlockSpec(tuple(w.shape), const_map) for w in packed_params]

    kernel = functools.partial(vade_kernel, block_b, needs_mask)

    call = pl.pallas_call(
        kernel,
        out_shape=jax.ShapeDtypeStruct((padded_batch, out_w), jnp.float32),
        grid_spec=pltpu.PrefetchScalarGridSpec(
            num_scalar_prefetch=1 if needs_mask else 0,
            grid=grid,
            in_specs=in_specs,
            out_specs=pl.BlockSpec((block_b, out_w), row_map),
        ),
        compiler_params=pltpu.CompilerParams(
            dimension_semantics=("parallel",),
            vmem_limit_bytes=vmem_limit,
        ),
    )

    if needs_mask:
        nvalid = jnp.array([batch], jnp.int32)
        packed_out = call(nvalid, x_p, eps_p, *packed_params)
    else:
        packed_out = call(x_p, eps_p, *packed_params)

    mu = packed_out[:batch, 0 * zp:0 * zp + z_dim]
    log_var = packed_out[:batch, 1 * zp:1 * zp + z_dim]
    z = packed_out[:batch, 2 * zp:2 * zp + z_dim]
    x_hat = packed_out[:batch, 3 * zp:3 * zp + in_dim]
    return mu, log_var, z, x_hat


if __name__ == "__main__":
    IN_DIM, Z_DIM, BATCH = 64, 8, 8

    key = jax.random.PRNGKey(0)
    kx, keps, kparams = jax.random.split(key, 3)

    x = jax.random.normal(kx, (BATCH, IN_DIM), jnp.float32)
    eps = jax.random.normal(keps, (BATCH, Z_DIM), jnp.float32)

    raw_params = init_params(kparams, in_dim=IN_DIM, z_dim=Z_DIM)
    params = pack_params(raw_params, in_dim=IN_DIM, z_dim=Z_DIM)

    # Fast path: batch is a multiple of 8 -> no row mask, no scalar prefetch.
    mu, log_var, z, x_hat = vade_forward(x, eps, params)
    jax.block_until_ready((mu, log_var, z, x_hat))

    assert mu.shape == (BATCH, Z_DIM)
    assert log_var.shape == (BATCH, Z_DIM)
    assert z.shape == (BATCH, Z_DIM)
    assert x_hat.shape == (BATCH, IN_DIM)
    assert bool(jnp.isfinite(mu).all() & jnp.isfinite(log_var).all()
                & jnp.isfinite(z).all() & jnp.isfinite(x_hat).all())

    # Masked path: a batch that is not a multiple of 8 exercises the padded-row BN masking.
    B2 = 5
    mu2, lv2, z2, xh2 = vade_forward(x[:B2], eps[:B2], params)
    jax.block_until_ready((mu2, lv2, z2, xh2))
    assert mu2.shape == (B2, Z_DIM) and xh2.shape == (B2, IN_DIM)
    assert bool(jnp.isfinite(mu2).all() & jnp.isfinite(lv2).all()
                & jnp.isfinite(z2).all() & jnp.isfinite(xh2).all())

    print("KERNEL_OK")
</pallas_src>

<mosaic_0001>
module attributes {stable_mosaic.version = 11 : i64} {
  func.func @vade_kernel(%arg0: i32, %arg1: memref<8x64xf32, #tpu.memory_space<vmem>>, %arg2: memref<8x128xf32, #tpu.memory_space<vmem>>, %arg3: memref<64x512xbf16, #tpu.memory_space<vmem>>, %arg4: memref<1x512xf32, #tpu.memory_space<vmem>>, %arg5: memref<1x512xf32, #tpu.memory_space<vmem>>, %arg6: memref<512x256xbf16, #tpu.memory_space<vmem>>, %arg7: memref<1x256xf32, #tpu.memory_space<vmem>>, %arg8: memref<1x256xf32, #tpu.memory_space<vmem>>, %arg9: memref<256x128xbf16, #tpu.memory_space<vmem>>, %arg10: memref<1x128xf32, #tpu.memory_space<vmem>>, %arg11: memref<1x128xf32, #tpu.memory_space<vmem>>, %arg12: memref<128x256xbf16, #tpu.memory_space<vmem>>, %arg13: memref<1x256xf32, #tpu.memory_space<vmem>>, %arg14: memref<128x128xbf16, #tpu.memory_space<vmem>>, %arg15: memref<1x128xf32, #tpu.memory_space<vmem>>, %arg16: memref<1x128xf32, #tpu.memory_space<vmem>>, %arg17: memref<128x256xbf16, #tpu.memory_space<vmem>>, %arg18: memref<1x256xf32, #tpu.memory_space<vmem>>, %arg19: memref<1x256xf32, #tpu.memory_space<vmem>>, %arg20: memref<256x512xbf16, #tpu.memory_space<vmem>>, %arg21: memref<1x512xf32, #tpu.memory_space<vmem>>, %arg22: memref<1x512xf32, #tpu.memory_space<vmem>>, %arg23: memref<512x128xbf16, #tpu.memory_space<vmem>>, %arg24: memref<1x128xf32, #tpu.memory_space<vmem>>, %arg25: memref<8x512xf32, #tpu.memory_space<vmem>>) attributes {dimension_semantics = [#tpu.dimension_semantics<parallel>], iteration_bounds = array<i64: 1>, scalar_prefetch = 0 : i64, scratch_operands = 0 : i64, tpu.core_type = #tpu.core_type<tc>, window_params = [{transform_indices = @transform_0, window_bounds = array<i64: 8, 64>}, {transform_indices = @transform_1, window_bounds = array<i64: 8, 128>}, {pipeline_mode = #tpu.pipeline_mode<synchronous>, transform_indices = @transform_2, window_bounds = array<i64: 64, 512>}, {pipeline_mode = #tpu.pipeline_mode<synchronous>, transform_indices = @transform_3, window_bounds = array<i64: 1, 512>}, {pipeline_mode = #tpu.pipeline_mode<synchronous>, transform_indices = @transform_4, window_bounds = array<i64: 1, 512>}, {pipeline_mode = #tpu.pipeline_mode<synchronous>, transform_indices = @transform_5, window_bounds = array<i64: 512, 256>}, {pipeline_mode = #tpu.pipeline_mode<synchronous>, transform_indices = @transform_6, window_bounds = array<i64: 1, 256>}, {pipeline_mode = #tpu.pipeline_mode<synchronous>, transform_indices = @transform_7, window_bounds = array<i64: 1, 256>}, {pipeline_mode = #tpu.pipeline_mode<synchronous>, transform_indices = @transform_8, window_bounds = array<i64: 256, 128>}, {pipeline_mode = #tpu.pipeline_mode<synchronous>, transform_indices = @transform_9, window_bounds = array<i64: 1, 128>}, {pipeline_mode = #tpu.pipeline_mode<synchronous>, transform_indices = @transform_10, window_bounds = array<i64: 1, 128>}, {pipeline_mode = #tpu.pipeline_mode<synchronous>, transform_indices = @transform_11, window_bounds = array<i64: 128, 256>}, {pipeline_mode = #tpu.pipeline_mode<synchronous>, transform_indices = @transform_12, window_bounds = array<i64: 1, 256>}, {pipeline_mode = #tpu.pipeline_mode<synchronous>, transform_indices = @transform_13, window_bounds = array<i64: 128, 128>}, {pipeline_mode = #tpu.pipeline_mode<synchronous>, transform_indices = @transform_14, window_bounds = array<i64: 1, 128>}, {pipeline_mode = #tpu.pipeline_mode<synchronous>, transform_indices = @transform_15, window_bounds = array<i64: 1, 128>}, {pipeline_mode = #tpu.pipeline_mode<synchronous>, transform_indices = @transform_16, window_bounds = array<i64: 128, 256>}, {pipeline_mode = #tpu.pipeline_mode<synchronous>, transform_indices = @transform_17, window_bounds = array<i64: 1, 256>}, {pipeline_mode = #tpu.pipeline_mode<synchronous>, transform_indices = @transform_18, window_bounds = array<i64: 1, 256>}, {pipeline_mode = #tpu.pipeline_mode<synchronous>, transform_indices = @transform_19, window_bounds = array<i64: 256, 512>}, {pipeline_mode = #tpu.pipeline_mode<synchronous>, transform_indices = @transform_20, window_bounds = array<i64: 1, 512>}, {pipeline_mode = #tpu.pipeline_mode<synchronous>, transform_indices = @transform_21, window_bounds = array<i64: 1, 512>}, {pipeline_mode = #tpu.pipeline_mode<synchronous>, transform_indices = @transform_22, window_bounds = array<i64: 512, 128>}, {pipeline_mode = #tpu.pipeline_mode<synchronous>, transform_indices = @transform_23, window_bounds = array<i64: 1, 128>}, {transform_indices = @transform_24, window_bounds = array<i64: 8, 512>}]} {
    %c0 = arith.constant 0 : index
    %c0_0 = arith.constant 0 : index
    %0 = vector.load %arg1[%c0, %c0_0] : memref<8x64xf32, #tpu.memory_space<vmem>>, vector<8x64xf32>
    %1 = arith.truncf %0 : vector<8x64xf32> to vector<8x64xbf16>
    %c0_1 = arith.constant 0 : index
    %c0_2 = arith.constant 0 : index
    %2 = vector.load %arg3[%c0_1, %c0_2] : memref<64x512xbf16, #tpu.memory_space<vmem>>, vector<64x512xbf16>
    %cst = arith.constant dense<0.000000e+00> : vector<8x512xf32>
    %3 = tpu.matmul %1, %2, %cst {dimension_numbers = #tpu.dot_dimension_numbers<[1], [0], [0], [1], [0, 0, 1, 1], [], []>} : vector<8x64xbf16>, vector<64x512xbf16>, vector<8x512xf32> -> vector<8x512xf32>
    %cst_3 = arith.constant dense<0.000000e+00> : vector<512xf32>
    %4 = vector.multi_reduction <add>, %3, %cst_3 [0] : vector<8x512xf32> to vector<512xf32>
    %5 = vector.shape_cast %4 : vector<512xf32> to vector<1x512xf32>
    %cst_4 = arith.constant 1.250000e-01 : f32
    %6 = vector.broadcast %cst_4 : f32 to vector<1x512xf32>
    %7 = arith.mulf %5, %6 : vector<1x512xf32>
    %8 = arith.mulf %3, %3 : vector<8x512xf32>
    %cst_5 = arith.constant dense<0.000000e+00> : vector<512xf32>
    %9 = vector.multi_reduction <add>, %8, %cst_5 [0] : vector<8x512xf32> to vector<512xf32>
    %10 = vector.shape_cast %9 : vector<512xf32> to vector<1x512xf32>
    %cst_6 = arith.constant 1.250000e-01 : f32
    %11 = vector.broadcast %cst_6 : f32 to vector<1x512xf32>
    %12 = arith.mulf %10, %11 : vector<1x512xf32>
    %13 = arith.mulf %7, %7 : vector<1x512xf32>
    %14 = arith.subf %12, %13 : vector<1x512xf32>
    %c0_7 = arith.constant 0 : index
    %c0_8 = arith.constant 0 : index
    %15 = vector.load %arg4[%c0_7, %c0_8] : memref<1x512xf32, #tpu.memory_space<vmem>>, vector<1x512xf32>
    %cst_9 = arith.constant 9.99999974E-6 : f32
    %16 = vector.broadcast %cst_9 : f32 to vector<1x512xf32>
    %17 = arith.addf %14, %16 : vector<1x512xf32>
    %18 = math.rsqrt %17 : vector<1x512xf32>
    %19 = arith.mulf %15, %18 : vector<1x512xf32>
    %c0_10 = arith.constant 0 : index
    %c0_11 = arith.constant 0 : index
    %20 = vector.load %arg5[%c0_10, %c0_11] : memref<1x512xf32, #tpu.memory_space<vmem>>, vector<1x512xf32>
    %21 = arith.mulf %7, %19 : vector<1x512xf32>
    %22 = arith.subf %20, %21 : vector<1x512xf32>
    %23 = vector.broadcast %19 : vector<1x512xf32> to vector<8x512xf32>
    %24 = arith.mulf %3, %23 : vector<8x512xf32>
    %25 = vector.broadcast %22 : vector<1x512xf32> to vector<8x512xf32>
    %26 = arith.addf %24, %25 : vector<8x512xf32>
    %cst_12 = arith.constant 0.00999999977 : f32
    %27 = vector.broadcast %cst_12 : f32 to vector<8x512xf32>
    %28 = arith.mulf %27, %26 : vector<8x512xf32>
    %29 = arith.maximumf %26, %28 : vector<8x512xf32>
    %30 = arith.truncf %29 : vector<8x512xf32> to vector<8x512xbf16>
    %c0_13 = arith.constant 0 : index
    %c0_14 = arith.constant 0 : index
    %31 = vector.load %arg6[%c0_13, %c0_14] : memref<512x256xbf16, #tpu.memory_space<vmem>>, vector<512x256xbf16>
    %cst_15 = arith.constant dense<0.000000e+00> : vector<8x256xf32>
    %32 = tpu.matmul %30, %31, %cst_15 {dimension_numbers = #tpu.dot_dimension_numbers<[1], [0], [0], [1], [0, 0, 1, 1], [], []>} : vector<8x512xbf16>, vector<512x256xbf16>, vector<8x256xf32> -> vector<8x256xf32>
    %cst_16 = arith.constant dense<0.000000e+00> : vector<256xf32>
    %33 = vector.multi_reduction <add>, %32, %cst_16 [0] : vector<8x256xf32> to vector<256xf32>
    %34 = vector.shape_cast %33 : vector<256xf32> to vector<1x256xf32>
    %cst_17 = arith.constant 1.250000e-01 : f32
    %35 = vector.broadcast %cst_17 : f32 to vector<1x256xf32>
    %36 = arith.mulf %34, %35 : vector<1x256xf32>
    %37 = arith.mulf %32, %32 : vector<8x256xf32>
    %cst_18 = arith.constant dense<0.000000e+00> : vector<256xf32>
    %38 = vector.multi_reduction <add>, %37, %cst_18 [0] : vector<8x256xf32> to vector<256xf32>
    %39 = vector.shape_cast %38 : vector<256xf32> to vector<1x256xf32>
    %cst_19 = arith.constant 1.250000e-01 : f32
    %40 = vector.broadcast %cst_19 : f32 to vector<1x256xf32>
    %41 = arith.mulf %39, %40 : vector<1x256xf32>
    %42 = arith.mulf %36, %36 : vector<1x256xf32>
    %43 = arith.subf %41, %42 : vector<1x256xf32>
    %c0_20 = arith.constant 0 : index
    %c0_21 = arith.constant 0 : index
    %44 = vector.load %arg7[%c0_20, %c0_21] : memref<1x256xf32, #tpu.memory_space<vmem>>, vector<1x256xf32>
    %cst_22 = arith.constant 9.99999974E-6 : f32
    %45 = vector.broadcast %cst_22 : f32 to vector<1x256xf32>
    %46 = arith.addf %43, %45 : vector<1x256xf32>
    %47 = math.rsqrt %46 : vector<1x256xf32>
    %48 = arith.mulf %44, %47 : vector<1x256xf32>
    %c0_23 = arith.constant 0 : index
    %c0_24 = arith.constant 0 : index
    %49 = vector.load %arg8[%c0_23, %c0_24] : memref<1x256xf32, #tpu.memory_space<vmem>>, vector<1x256xf32>
    %50 = arith.mulf %36, %48 : vector<1x256xf32>
    %51 = arith.subf %49, %50 : vector<1x256xf32>
    %52 = vector.broadcast %48 : vector<1x256xf32> to vector<8x256xf32>
    %53 = arith.mulf %32, %52 : vector<8x256xf32>
    %54 = vector.broadcast %51 : vector<1x256xf32> to vector<8x256xf32>
    %55 = arith.addf %53, %54 : vector<8x256xf32>
    %cst_25 = arith.constant 0.00999999977 : f32
    %56 = vector.broadcast %cst_25 : f32 to vector<8x256xf32>
    %57 = arith.mulf %56, %55 : vector<8x256xf32>
    %58 = arith.maximumf %55, %57 : vector<8x256xf32>
    %59 = arith.truncf %58 : vector<8x256xf32> to vector<8x256xbf16>
    %c0_26 = arith.constant 0 : index
    %c0_27 = arith.constant 0 : index
    %60 = vector.load %arg9[%c0_26, %c0_27] : memref<256x128xbf16, #tpu.memory_space<vmem>>, vector<256x128xbf16>
    %cst_28 = arith.constant dense<0.000000e+00> : vector<8x128xf32>
    %61 = tpu.matmul %59, %60, %cst_28 {dimension_numbers = #tpu.dot_dimension_numbers<[1], [0], [0], [1], [0, 0, 1, 1], [], []>} : vector<8x256xbf16>, vector<256x128xbf16>, vector<8x128xf32> -> vector<8x128xf32>
    %cst_29 = arith.constant dense<0.000000e+00> : vector<128xf32>
    %62 = vector.multi_reduction <add>, %61, %cst_29 [0] : vector<8x128xf32> to vector<128xf32>
    %63 = vector.shape_cast %62 : vector<128xf32> to vector<1x128xf32>
    %cst_30 = arith.constant 1.250000e-01 : f32
    %64 = vector.broadcast %cst_30 : f32 to vector<1x128xf32>
    %65 = arith.mulf %63, %64 : vector<1x128xf32>
    %66 = arith.mulf %61, %61 : vector<8x128xf32>
    %cst_31 = arith.constant dense<0.000000e+00> : vector<128xf32>
    %67 = vector.multi_reduction <add>, %66, %cst_31 [0] : vector<8x128xf32> to vector<128xf32>
    %68 = vector.shape_cast %67 : vector<128xf32> to vector<1x128xf32>
    %cst_32 = arith.constant 1.250000e-01 : f32
    %69 = vector.broadcast %cst_32 : f32 to vector<1x128xf32>
    %70 = arith.mulf %68, %69 : vector<1x128xf32>
    %71 = arith.mulf %65, %65 : vector<1x128xf32>
    %72 = arith.subf %70, %71 : vector<1x128xf32>
    %c0_33 = arith.constant 0 : index
    %c0_34 = arith.constant 0 : index
    %73 = vector.load %arg10[%c0_33, %c0_34] : memref<1x128xf32, #tpu.memory_space<vmem>>, vector<1x128xf32>
    %cst_35 = arith.constant 9.99999974E-6 : f32
    %74 = vector.broadcast %cst_35 : f32 to vector<1x128xf32>
    %75 = arith.addf %72, %74 : vector<1x128xf32>
    %76 = math.rsqrt %75 : vector<1x128xf32>
    %77 = arith.mulf %73, %76 : vector<1x128xf32>
    %c0_36 = arith.constant 0 : index
    %c0_37 = arith.constant 0 : index
    %78 = vector.load %arg11[%c0_36, %c0_37] : memref<1x128xf32, #tpu.memory_space<vmem>>, vector<1x128xf32>
    %79 = arith.mulf %65, %77 : vector<1x128xf32>
    %80 = arith.subf %78, %79 : vector<1x128xf32>
    %81 = vector.broadcast %77 : vector<1x128xf32> to vector<8x128xf32>
    %82 = arith.mulf %61, %81 : vector<8x128xf32>
    %83 = vector.broadcast %80 : vector<1x128xf32> to vector<8x128xf32>
    %84 = arith.addf %82, %83 : vector<8x128xf32>
    %cst_38 = arith.constant 0.00999999977 : f32
    %85 = vector.broadcast %cst_38 : f32 to vector<8x128xf32>
    %86 = arith.mulf %85, %84 : vector<8x128xf32>
    %87 = arith.maximumf %84, %86 : vector<8x128xf32>
    %88 = arith.truncf %87 : vector<8x128xf32> to vector<8x128xbf16>
    %c0_39 = arith.constant 0 : index
    %c0_40 = arith.constant 0 : index
    %89 = vector.load %arg12[%c0_39, %c0_40] : memref<128x256xbf16, #tpu.memory_space<vmem>>, vector<128x256xbf16>
    %cst_41 = arith.constant dense<0.000000e+00> : vector<8x256xf32>
    %90 = tpu.matmul %88, %89, %cst_41 {dimension_numbers = #tpu.dot_dimension_numbers<[1], [0], [0], [1], [0, 0, 1, 1], [], []>} : vector<8x128xbf16>, vector<128x256xbf16>, vector<8x256xf32> -> vector<8x256xf32>
    %c0_42 = arith.constant 0 : index
    %c0_43 = arith.constant 0 : index
    %91 = vector.load %arg13[%c0_42, %c0_43] : memref<1x256xf32, #tpu.memory_space<vmem>>, vector<1x256xf32>
    %92 = vector.broadcast %91 : vector<1x256xf32> to vector<8x256xf32>
    %93 = arith.addf %90, %92 : vector<8x256xf32>
    %94 = vector.extract_strided_slice %93 {offsets = [0, 0], sizes = [8, 128], strides = [1, 1]} : vector<8x256xf32> to vector<8x128xf32>
    %95 = vector.extract_strided_slice %93 {offsets = [0, 128], sizes = [8, 128], strides = [1, 1]} : vector<8x256xf32> to vector<8x128xf32>
    %c0_44 = arith.constant 0 : index
    %c0_45 = arith.constant 0 : index
    %96 = vector.load %arg2[%c0_44, %c0_45] : memref<8x128xf32, #tpu.memory_space<vmem>>, vector<8x128xf32>
    %cst_46 = arith.constant 5.000000e-01 : f32
    %97 = vector.broadcast %cst_46 : f32 to vector<8x128xf32>
    %98 = arith.mulf %97, %95 : vector<8x128xf32>
    %99 = math.exp %98 : vector<8x128xf32>
    %100 = arith.mulf %96, %99 : vector<8x128xf32>
    %101 = arith.addf %94, %100 : vector<8x128xf32>
    %102 = arith.truncf %101 : vector<8x128xf32> to vector<8x128xbf16>
    %c0_47 = arith.constant 0 : index
    %c0_48 = arith.constant 0 : index
    %103 = vector.load %arg14[%c0_47, %c0_48] : memref<128x128xbf16, #tpu.memory_space<vmem>>, vector<128x128xbf16>
    %cst_49 = arith.constant dense<0.000000e+00> : vector<8x128xf32>
    %104 = tpu.matmul %102, %103, %cst_49 {dimension_numbers = #tpu.dot_dimension_numbers<[1], [0], [0], [1], [0, 0, 1, 1], [], []>} : vector<8x128xbf16>, vector<128x128xbf16>, vector<8x128xf32> -> vector<8x128xf32>
    %cst_50 = arith.constant dense<0.000000e+00> : vector<128xf32>
    %105 = vector.multi_reduction <add>, %104, %cst_50 [0] : vector<8x128xf32> to vector<128xf32>
    %106 = vector.shape_cast %105 : vector<128xf32> to vector<1x128xf32>
    %cst_51 = arith.constant 1.250000e-01 : f32
    %107 = vector.broadcast %cst_51 : f32 to vector<1x128xf32>
    %108 = arith.mulf %106, %107 : vector<1x128xf32>
    %109 = arith.mulf %104, %104 : vector<8x128xf32>
    %cst_52 = arith.constant dense<0.000000e+00> : vector<128xf32>
    %110 = vector.multi_reduction <add>, %109, %cst_52 [0] : vector<8x128xf32> to vector<128xf32>
    %111 = vector.shape_cast %110 : vector<128xf32> to vector<1x128xf32>
    %cst_53 = arith.constant 1.250000e-01 : f32
    %112 = vector.broadcast %cst_53 : f32 to vector<1x128xf32>
    %113 = arith.mulf %111, %112 : vector<1x128xf32>
    %114 = arith.mulf %108, %108 : vector<1x128xf32>
    %115 = arith.subf %113, %114 : vector<1x128xf32>
    %c0_54 = arith.constant 0 : index
    %c0_55 = arith.constant 0 : index
    %116 = vector.load %arg15[%c0_54, %c0_55] : memref<1x128xf32, #tpu.memory_space<vmem>>, vector<1x128xf32>
    %cst_56 = arith.constant 9.99999974E-6 : f32
    %117 = vector.broadcast %cst_56 : f32 to vector<1x128xf32>
    %118 = arith.addf %115, %117 : vector<1x128xf32>
    %119 = math.rsqrt %118 : vector<1x128xf32>
    %120 = arith.mulf %116, %119 : vector<1x128xf32>
    %c0_57 = arith.constant 0 : index
    %c0_58 = arith.constant 0 : index
    %121 = vector.load %arg16[%c0_57, %c0_58] : memref<1x128xf32, #tpu.memory_space<vmem>>, vector<1x128xf32>
    %122 = arith.mulf %108, %120 : vector<1x128xf32>
    %123 = arith.subf %121, %122 : vector<1x128xf32>
    %124 = vector.broadcast %120 : vector<1x128xf32> to vector<8x128xf32>
    %125 = arith.mulf %104, %124 : vector<8x128xf32>
    %126 = vector.broadcast %123 : vector<1x128xf32> to vector<8x128xf32>
    %127 = arith.addf %125, %126 : vector<8x128xf32>
    %cst_59 = arith.constant 0.00999999977 : f32
    %128 = vector.broadcast %cst_59 : f32 to vector<8x128xf32>
    %129 = arith.mulf %128, %127 : vector<8x128xf32>
    %130 = arith.maximumf %127, %129 : vector<8x128xf32>
    %131 = arith.truncf %130 : vector<8x128xf32> to vector<8x128xbf16>
    %c0_60 = arith.constant 0 : index
    %c0_61 = arith.constant 0 : index
    %132 = vector.load %arg17[%c0_60, %c0_61] : memref<128x256xbf16, #tpu.memory_space<vmem>>, vector<128x256xbf16>
    %cst_62 = arith.constant dense<0.000000e+00> : vector<8x256xf32>
    %133 = tpu.matmul %131, %132, %cst_62 {dimension_numbers = #tpu.dot_dimension_numbers<[1], [0], [0], [1], [0, 0, 1, 1], [], []>} : vector<8x128xbf16>, vector<128x256xbf16>, vector<8x256xf32> -> vector<8x256xf32>
    %cst_63 = arith.constant dense<0.000000e+00> : vector<256xf32>
    %134 = vector.multi_reduction <add>, %133, %cst_63 [0] : vector<8x256xf32> to vector<256xf32>
    %135 = vector.shape_cast %134 : vector<256xf32> to vector<1x256xf32>
    %cst_64 = arith.constant 1.250000e-01 : f32
    %136 = vector.broadcast %cst_64 : f32 to vector<1x256xf32>
    %137 = arith.mulf %135, %136 : vector<1x256xf32>
    %138 = arith.mulf %133, %133 : vector<8x256xf32>
    %cst_65 = arith.constant dense<0.000000e+00> : vector<256xf32>
    %139 = vector.multi_reduction <add>, %138, %cst_65 [0] : vector<8x256xf32> to vector<256xf32>
    %140 = vector.shape_cast %139 : vector<256xf32> to vector<1x256xf32>
    %cst_66 = arith.constant 1.250000e-01 : f32
    %141 = vector.broadcast %cst_66 : f32 to vector<1x256xf32>
    %142 = arith.mulf %140, %141 : vector<1x256xf32>
    %143 = arith.mulf %137, %137 : vector<1x256xf32>
    %144 = arith.subf %142, %143 : vector<1x256xf32>
    %c0_67 = arith.constant 0 : index
    %c0_68 = arith.constant 0 : index
    %145 = vector.load %arg18[%c0_67, %c0_68] : memref<1x256xf32, #tpu.memory_space<vmem>>, vector<1x256xf32>
    %cst_69 = arith.constant 9.99999974E-6 : f32
    %146 = vector.broadcast %cst_69 : f32 to vector<1x256xf32>
    %147 = arith.addf %144, %146 : vector<1x256xf32>
    %148 = math.rsqrt %147 : vector<1x256xf32>
    %149 = arith.mulf %145, %148 : vector<1x256xf32>
    %c0_70 = arith.constant 0 : index
    %c0_71 = arith.constant 0 : index
    %150 = vector.load %arg19[%c0_70, %c0_71] : memref<1x256xf32, #tpu.memory_space<vmem>>, vector<1x256xf32>
    %151 = arith.mulf %137, %149 : vector<1x256xf32>
    %152 = arith.subf %150, %151 : vector<1x256xf32>
    %153 = vector.broadcast %149 : vector<1x256xf32> to vector<8x256xf32>
    %154 = arith.mulf %133, %153 : vector<8x256xf32>
    %155 = vector.broadcast %152 : vector<1x256xf32> to vector<8x256xf32>
    %156 = arith.addf %154, %155 : vector<8x256xf32>
    %cst_72 = arith.constant 0.00999999977 : f32
    %157 = vector.broadcast %cst_72 : f32 to vector<8x256xf32>
    %158 = arith.mulf %157, %156 : vector<8x256xf32>
    %159 = arith.maximumf %156, %158 : vector<8x256xf32>
    %160 = arith.truncf %159 : vector<8x256xf32> to vector<8x256xbf16>
    %c0_73 = arith.constant 0 : index
    %c0_74 = arith.constant 0 : index
    %161 = vector.load %arg20[%c0_73, %c0_74] : memref<256x512xbf16, #tpu.memory_space<vmem>>, vector<256x512xbf16>
    %cst_75 = arith.constant dense<0.000000e+00> : vector<8x512xf32>
    %162 = tpu.matmul %160, %161, %cst_75 {dimension_numbers = #tpu.dot_dimension_numbers<[1], [0], [0], [1], [0, 0, 1, 1], [], []>} : vector<8x256xbf16>, vector<256x512xbf16>, vector<8x512xf32> -> vector<8x512xf32>
    %cst_76 = arith.constant dense<0.000000e+00> : vector<512xf32>
    %163 = vector.multi_reduction <add>, %162, %cst_76 [0] : vector<8x512xf32> to vector<512xf32>
    %164 = vector.shape_cast %163 : vector<512xf32> to vector<1x512xf32>
    %cst_77 = arith.constant 1.250000e-01 : f32
    %165 = vector.broadcast %cst_77 : f32 to vector<1x512xf32>
    %166 = arith.mulf %164, %165 : vector<1x512xf32>
    %167 = arith.mulf %162, %162 : vector<8x512xf32>
    %cst_78 = arith.constant dense<0.000000e+00> : vector<512xf32>
    %168 = vector.multi_reduction <add>, %167, %cst_78 [0] : vector<8x512xf32> to vector<512xf32>
    %169 = vector.shape_cast %168 : vector<512xf32> to vector<1x512xf32>
    %cst_79 = arith.constant 1.250000e-01 : f32
    %170 = vector.broadcast %cst_79 : f32 to vector<1x512xf32>
    %171 = arith.mulf %169, %170 : vector<1x512xf32>
    %172 = arith.mulf %166, %166 : vector<1x512xf32>
    %173 = arith.subf %171, %172 : vector<1x512xf32>
    %c0_80 = arith.constant 0 : index
    %c0_81 = arith.constant 0 : index
    %174 = vector.load %arg21[%c0_80, %c0_81] : memref<1x512xf32, #tpu.memory_space<vmem>>, vector<1x512xf32>
    %cst_82 = arith.constant 9.99999974E-6 : f32
    %175 = vector.broadcast %cst_82 : f32 to vector<1x512xf32>
    %176 = arith.addf %173, %175 : vector<1x512xf32>
    %177 = math.rsqrt %176 : vector<1x512xf32>
    %178 = arith.mulf %174, %177 : vector<1x512xf32>
    %c0_83 = arith.constant 0 : index
    %c0_84 = arith.constant 0 : index
    %179 = vector.load %arg22[%c0_83, %c0_84] : memref<1x512xf32, #tpu.memory_space<vmem>>, vector<1x512xf32>
    %180 = arith.mulf %166, %178 : vector<1x512xf32>
    %181 = arith.subf %179, %180 : vector<1x512xf32>
    %182 = vector.broadcast %178 : vector<1x512xf32> to vector<8x512xf32>
    %183 = arith.mulf %162, %182 : vector<8x512xf32>
    %184 = vector.broadcast %181 : vector<1x512xf32> to vector<8x512xf32>
    %185 = arith.addf %183, %184 : vector<8x512xf32>
    %cst_85 = arith.constant 0.00999999977 : f32
    %186 = vector.broadcast %cst_85 : f32 to vector<8x512xf32>
    %187 = arith.mulf %186, %185 : vector<8x512xf32>
    %188 = arith.maximumf %185, %187 : vector<8x512xf32>
    %189 = arith.truncf %188 : vector<8x512xf32> to vector<8x512xbf16>
    %c0_86 = arith.constant 0 : index
    %c0_87 = arith.constant 0 : index
    %190 = vector.load %arg23[%c0_86, %c0_87] : memref<512x128xbf16, #tpu.memory_space<vmem>>, vector<512x128xbf16>
    %cst_88 = arith.constant dense<0.000000e+00> : vector<8x128xf32>
    %191 = tpu.matmul %189, %190, %cst_88 {dimension_numbers = #tpu.dot_dimension_numbers<[1], [0], [0], [1], [0, 0, 1, 1], [], []>} : vector<8x512xbf16>, vector<512x128xbf16>, vector<8x128xf32> -> vector<8x128xf32>
    %c0_89 = arith.constant 0 : index
    %c0_90 = arith.constant 0 : index
    %192 = vector.load %arg24[%c0_89, %c0_90] : memref<1x128xf32, #tpu.memory_space<vmem>>, vector<1x128xf32>
    %193 = vector.broadcast %192 : vector<1x128xf32> to vector<8x128xf32>
    %194 = arith.addf %191, %193 : vector<8x128xf32>
    %195 = math.tanh %194 : vector<8x128xf32>
    %c0_91 = arith.constant 0 : index
    %c0_92 = arith.constant 0 : index
    %196 = vector.load %arg25[%c0_91, %c0_92] : memref<8x512xf32, #tpu.memory_space<vmem>>, vector<8x128xf32>
    tpu.vector_store %arg25[%c0_91, %c0_92], %94 {strides = array<i32>} : memref<8x512xf32, #tpu.memory_space<vmem>>, vector<8x128xf32>,
    %c0_93 = arith.constant 0 : index
    %c128 = arith.constant 128 : index
    %197 = vector.load %arg25[%c0_93, %c128] : memref<8x512xf32, #tpu.memory_space<vmem>>, vector<8x128xf32>
    tpu.vector_store %arg25[%c0_93, %c128], %95 {strides = array<i32>} : memref<8x512xf32, #tpu.memory_space<vmem>>, vector<8x128xf32>,
    %c0_94 = arith.constant 0 : index
    %c256 = arith.constant 256 : index
    %198 = vector.load %arg25[%c0_94, %c256] : memref<8x512xf32, #tpu.memory_space<vmem>>, vector<8x128xf32>
    tpu.vector_store %arg25[%c0_94, %c256], %101 {strides = array<i32>} : memref<8x512xf32, #tpu.memory_space<vmem>>, vector<8x128xf32>,
    %c0_95 = arith.constant 0 : index
    %c384 = arith.constant 384 : index
    %199 = vector.load %arg25[%c0_95, %c384] : memref<8x512xf32, #tpu.memory_space<vmem>>, vector<8x128xf32>
    tpu.vector_store %arg25[%c0_95, %c384], %195 {strides = array<i32>} : memref<8x512xf32, #tpu.memory_space<vmem>>, vector<8x128xf32>,
    return
  }
  func.func @transform_0(%arg0: i32) -> (i32, i32) {
    %c0_i32 = arith.constant 0 : i32
    %c0_i32_0 = arith.constant 0 : i32
    return %arg0, %c0_i32 : i32, i32
  }
  func.func @transform_1(%arg0: i32) -> (i32, i32) {
    %c0_i32 = arith.constant 0 : i32
    %c0_i32_0 = arith.constant 0 : i32
    return %arg0, %c0_i32 : i32, i32
  }
  func.func @transform_2(%arg0: i32) -> (i32, i32) {
    %c0_i32 = arith.constant 0 : i32
    %c0_i32_0 = arith.constant 0 : i32
    %c0_i32_1 = arith.constant 0 : i32
    return %c0_i32, %c0_i32_0 : i32, i32
  }
  func.func @transform_3(%arg0: i32) -> (i32, i32) {
    %c0_i32 = arith.constant 0 : i32
    %c0_i32_0 = arith.constant 0 : i32
    %c0_i32_1 = arith.constant 0 : i32
    return %c0_i32, %c0_i32_0 : i32, i32
  }
  func.func @transform_4(%arg0: i32) -> (i32, i32) {
    %c0_i32 = arith.constant 0 : i32
    %c0_i32_0 = arith.constant 0 : i32
    %c0_i32_1 = arith.constant 0 : i32
    return %c0_i32, %c0_i32_0 : i32, i32
  }
  func.func @transform_5(%arg0: i32) -> (i32, i32) {
    %c0_i32 = arith.constant 0 : i32
    %c0_i32_0 = arith.constant 0 : i32
    %c0_i32_1 = arith.constant 0 : i32
    return %c0_i32, %c0_i32_0 : i32, i32
  }
  func.func @transform_6(%arg0: i32) -> (i32, i32) {
    %c0_i32 = arith.constant 0 : i32
    %c0_i32_0 = arith.constant 0 : i32
    %c0_i32_1 = arith.constant 0 : i32
    return %c0_i32, %c0_i32_0 : i32, i32
  }
  func.func @transform_7(%arg0: i32) -> (i32, i32) {
    %c0_i32 = arith.constant 0 : i32
    %c0_i32_0 = arith.constant 0 : i32
    %c0_i32_1 = arith.constant 0 : i32
    return %c0_i32, %c0_i32_0 : i32, i32
  }
  func.func @transform_8(%arg0: i32) -> (i32, i32) {
    %c0_i32 = arith.constant 0 : i32
    %c0_i32_0 = arith.constant 0 : i32
    %c0_i32_1 = arith.constant 0 : i32
    return %c0_i32, %c0_i32_0 : i32, i32
  }
  func.func @transform_9(%arg0: i32) -> (i32, i32) {
    %c0_i32 = arith.constant 0 : i32
    %c0_i32_0 = arith.constant 0 : i32
    %c0_i32_1 = arith.constant 0 : i32
    return %c0_i32, %c0_i32_0 : i32, i32
  }
  func.func @transform_10(%arg0: i32) -> (i32, i32) {
    %c0_i32 = arith.constant 0 : i32
    %c0_i32_0 = arith.constant 0 : i32
    %c0_i32_1 = arith.constant 0 : i32
    return %c0_i32, %c0_i32_0 : i32, i32
  }
  func.func @transform_11(%arg0: i32) -> (i32, i32) {
    %c0_i32 = arith.constant 0 : i32
    %c0_i32_0 = arith.constant 0 : i32
    %c0_i32_1 = arith.constant 0 : i32
    return %c0_i32, %c0_i32_0 : i32, i32
  }
  func.func @transform_12(%arg0: i32) -> (i32, i32) {
    %c0_i32 = arith.constant 0 : i32
    %c0_i32_0 = arith.constant 0 : i32
    %c0_i32_1 = arith.constant 0 : i32
    return %c0_i32, %c0_i32_0 : i32, i32
  }
  func.func @transform_13(%arg0: i32) -> (i32, i32) {
    %c0_i32 = arith.constant 0 : i32
    %c0_i32_0 = arith.constant 0 : i32
    %c0_i32_1 = arith.constant 0 : i32
    return %c0_i32, %c0_i32_0 : i32, i32
  }
  func.func @transform_14(%arg0: i32) -> (i32, i32) {
    %c0_i32 = arith.constant 0 : i32
    %c0_i32_0 = arith.constant 0 : i32
    %c0_i32_1 = arith.constant 0 : i32
    return %c0_i32, %c0_i32_0 : i32, i32
  }
  func.func @transform_15(%arg0: i32) -> (i32, i32) {
    %c0_i32 = arith.constant 0 : i32
    %c0_i32_0 = arith.constant 0 : i32
    %c0_i32_1 = arith.constant 0 : i32
    return %c0_i32, %c0_i32_0 : i32, i32
  }
  func.func @transform_16(%arg0: i32) -> (i32, i32) {
    %c0_i32 = arith.constant 0 : i32
    %c0_i32_0 = arith.constant 0 : i32
    %c0_i32_1 = arith.constant 0 : i32
    return %c0_i32, %c0_i32_0 : i32, i32
  }
  func.func @transform_17(%arg0: i32) -> (i32, i32) {
    %c0_i32 = arith.constant 0 : i32
    %c0_i32_0 = arith.constant 0 : i32
    %c0_i32_1 = arith.constant 0 : i32
    return %c0_i32, %c0_i32_0 : i32, i32
  }
  func.func @transform_18(%arg0: i32) -> (i32, i32) {
    %c0_i32 = arith.constant 0 : i32
    %c0_i32_0 = arith.constant 0 : i32
    %c0_i32_1 = arith.constant 0 : i32
    return %c0_i32, %c0_i32_0 : i32, i32
  }
  func.func @transform_19(%arg0: i32) -> (i32, i32) {
    %c0_i32 = arith.constant 0 : i32
    %c0_i32_0 = arith.constant 0 : i32
    %c0_i32_1 = arith.constant 0 : i32
    return %c0_i32, %c0_i32_0 : i32, i32
  }
  func.func @transform_20(%arg0: i32) -> (i32, i32) {
    %c0_i32 = arith.constant 0 : i32
    %c0_i32_0 = arith.constant 0 : i32
    %c0_i32_1 = arith.constant 0 : i32
    return %c0_i32, %c0_i32_0 : i32, i32
  }
  func.func @transform_21(%arg0: i32) -> (i32, i32) {
    %c0_i32 = arith.constant 0 : i32
    %c0_i32_0 = arith.constant 0 : i32
    %c0_i32_1 = arith.constant 0 : i32
    return %c0_i32, %c0_i32_0 : i32, i32
  }
  func.func @transform_22(%arg0: i32) -> (i32, i32) {
    %c0_i32 = arith.constant 0 : i32
    %c0_i32_0 = arith.constant 0 : i32
    %c0_i32_1 = arith.constant 0 : i32
    return %c0_i32, %c0_i32_0 : i32, i32
  }
  func.func @transform_23(%arg0: i32) -> (i32, i32) {
    %c0_i32 = arith.constant 0 : i32
    %c0_i32_0 = arith.constant 0 : i32
    %c0_i32_1 = arith.constant 0 : i32
    return %c0_i32, %c0_i32_0 : i32, i32
  }
  func.func @transform_24(%arg0: i32) -> (i32, i32) {
    %c0_i32 = arith.constant 0 : i32
    %c0_i32_0 = arith.constant 0 : i32
    return %arg0, %c0_i32 : i32, i32
  }
}

</mosaic_0001>

<bundles_post_ra>
// kernel: vade_forward.1
= control target key start
LH: loop header
LB: loop body
LE: loop exit
PB: predicated region body
PF: predicated region fallthrough
CT: control target
= control target key end

     0   :  { %s4245_s0 = inlined_call_operand.vmem [shape: f32[8,64], index: 0, kind: input, shape index: {}]   ;;  %s4246_s1 = inlined_call_operand.vmem [shape: f32[8,128], index: 1, kind: input, shape index: {}]   ;;  %s4247_s2 = inlined_call_operand.hbm [shape: bf16[64,512], index: 2, kind: input, shape index: {}]   ;;  %s4248_s3 = inlined_call_operand.vmem [shape: f32[1,512], index: 3, kind: input, shape index: {}]   ;;  %s4249_s4 = inlined_call_operand.vmem [shape: f32[1,512], index: 4, kind: input, shape index: {}]   ;;  %s4250_s5 = inlined_call_operand.hbm [shape: bf16[512,256], index: 5, kind: input, shape index: {}]   ;;  %s4251_s6 = inlined_call_operand.vmem [shape: f32[1,256], index: 6, kind: input, shape index: {}]   ;;  %s4252_s7 = inlined_call_operand.vmem [shape: f32[1,256], index: 7, kind: input, shape index: {}]   ;;  %s4253_s8 = inlined_call_operand.hbm [shape: bf16[256,128], index: 8, kind: input, shape index: {}]   ;;  %s4254_s9 = inlined_call_operand.vmem [shape: f32[1,128], index: 9, kind: input, shape index: {}]   ;;  %s4255_s10 = inlined_call_operand.vmem [shape: f32[1,128], index: 10, kind: input, shape index: {}]   ;;  %s4256_s11 = inlined_call_operand.hbm [shape: bf16[128,256], index: 11, kind: input, shape index: {}]   ;;  %s4257_s12 = inlined_call_operand.vmem [shape: f32[1,256], index: 12, kind: input, shape index: {}]   ;;  %s4258_s13 = inlined_call_operand.vmem [shape: bf16[128,128], index: 13, kind: input, shape index: {}]   ;;  %s4259_s14 = inlined_call_operand.vmem [shape: f32[1,128], index: 14, kind: input, shape index: {}]   ;;  %s4260_s15 = inlined_call_operand.vmem [shape: f32[1,128], index: 15, kind: input, shape index: {}]   ;;  %s4261_s16 = inlined_call_operand.hbm [shape: bf16[128,256], index: 16, kind: input, shape index: {}]   ;;  %s4262_s17 = inlined_call_operand.vmem [shape: f32[1,256], index: 17, kind: input, shape index: {}]   ;;  %s4263_s18 = inlined_call_operand.vmem [shape: f32[1,256], index: 18, kind: input, shape index: {}]   ;;  %s4264_s19 = inlined_call_operand.hbm [shape: bf16[256,512], index: 19, kind: input, shape index: {}]   ;;  %s4265_s20 = inlined_call_operand.vmem [shape: f32[1,512], index: 20, kind: input, shape index: {}]   ;;  %s4266_s21 = inlined_call_operand.vmem [shape: f32[1,512], index: 21, kind: input, shape index: {}]   ;;  %s4267_s22 = inlined_call_operand.hbm [shape: bf16[512,128], index: 22, kind: input, shape index: {}]   ;;  %s4268_s23 = inlined_call_operand.vmem [shape: f32[1,128], index: 23, kind: input, shape index: {}]   ;;  %s4269_s24 = inlined_call_operand.vmem [shape: f32[8,512], index: 24, kind: output, shape index: {}]  }
   0x1   :  { %4274 = sst [smem:[#allocation17_spill]] %s4245_s0 }
   0x2   :  { %4275 = sst [smem:[#allocation18_spill]] %s4246_s1 }
   0x3   :  { %4276 = sst [smem:[#allocation19_spill]] %s4247_s2 }
   0x4   :  { %4277 = sst [smem:[#allocation20_spill]] %s4248_s3 }
   0x5   :  { %4278 = sst [smem:[#allocation21_spill]] %s4249_s4 }
   0x6   :  { %4279 = sst [smem:[#allocation22_spill]] %s4250_s5 }
   0x7   :  { %4280 = sst [smem:[#allocation23_spill]] %s4251_s6 }
   0x8   :  { %4281 = sst [smem:[#allocation24_spill]] %s4252_s7 }
   0x9   :  { %4282 = sst [smem:[#allocation25_spill]] %s4253_s8 }
   0xa   :  { %4283 = sst [smem:[#allocation26_spill]] %s4268_s23 }
   0xb   :  { %29 = vsyncpa [#allocation3], 0 }
   0xc   :  { %30 = vsyncpa [#allocation5], 0 }
   0xd   :  { %31 = vsyncpa [#allocation8], 0 }
   0xe   :  { %32 = vsyncpa [#allocation11], 0  ;;  %s3789_s5 = smov [#allocation4]   ;;  %s4284_s6 = sld [smem:[#allocation22_spill]] }
   0xf   :  { %s58_s26 = sshll.u32 %s3789_s5, 4  ;;  %s59_s26 = int_to_ptr.vmem [resolvable:$true] %s58_s26 }
  0x14   :  { %s3627_s2 = scalar_lea.hbm %s4284_s6, 8192 }
  0x15   :  { %p3628_p0 = scmp.ne.s32.totalorder %s4284_s6, %s3627_s2  ;;  %p3631_p1 = scmp.lt.u32.totalorder %s3627_s2, %s4284_s6 }
  0x17   :  { %p3633_p2 = pnand %p3631_p1, %p3628_p0 }
  0x19   :  { %3636 = shalt.err (!%p3633_p2)
}
  0x1a   :  { %s3637_s3 = scalar_lea.vmem %s59_s26, 8192  ;;  %p3642_p4 = scmp.lt.s32.totalorder %s59_s26, %s59_s26 }
  0x1b   :  { %p3638_p3 = scmp.ne.s32.totalorder %s59_s26, %s3637_s3  ;;  %p3643_p5 = scmp.lt.s32.totalorder %s3637_s3, %s3637_s3 }
  0x1d   :  { %p3644_p6 = por %p3643_p5, %p3642_p4 }
  0x1f   :  { %p3645_p7 = pnand %p3644_p6, %p3638_p3 }
  0x21   :  { %3648 = shalt.err (!%p3645_p7)
}
  0x22   :  { %s4273_s25 = smov 128   ;;  %s3791_s8 = smov 8  }
  0x23   :  { %64 = dma.hbm_to_vmem [thread:$0]  %s4284_s6, 8192, %s59_s26, [#allocation5], %s4273_s25, %s4273_s25, %s3791_s8  }
  0x24   :  { %s3792_s5 = smov [#allocation7]   ;;  %s3649_s29 = scalar_lea.hbm %s4256_s11, 2048 }
  0x25   :  { %s90_s27 = sshll.u32 %s3792_s5, 4  ;;  %p3650_p8 = scmp.ne.s32.totalorder %s4256_s11, %s3649_s29  ;;  %s91_s27 = int_to_ptr.vmem [resolvable:$true] %s90_s27 }
  0x26   :  { %p3653_p9 = scmp.lt.u32.totalorder %s3649_s29, %s4256_s11 }
  0x28   :  { %p3655_p10 = pnand %p3653_p9, %p3650_p8 }
  0x2a   :  { %3658 = shalt.err (!%p3655_p10)
}
  0x2b   :  { %s3659_s23 = scalar_lea.vmem %s91_s27, 2048  ;;  %p3664_p12 = scmp.lt.s32.totalorder %s91_s27, %s91_s27 }
  0x2c   :  { %p3660_p11 = scmp.ne.s32.totalorder %s91_s27, %s3659_s23  ;;  %p3665_p13 = scmp.lt.s32.totalorder %s3659_s23, %s3659_s23 }
  0x2e   :  { %p3666_p0 = por %p3665_p13, %p3664_p12 }
  0x30   :  { %p3667_p1 = pnand %p3666_p0, %p3660_p11 }
  0x32   :  { %3670 = shalt.err (!%p3667_p1)
}
  0x33   :  { %96 = dma.hbm_to_vmem [thread:$0]  %s4256_s11, 2048, %s91_s27, [#allocation8], %s4273_s25, %s4273_s25, %s3791_s8  }
  0x34   :  { %s3793_s4 = smov [#allocation10]   ;;  %s3794_s5 = smov [#allocation2]  }
  0x35   :  { %s126_s1 = sshll.u32 %s3793_s4, 4  ;;  %s42_s28 = sshll.u32 %s3794_s5, 4  ;;  %s127_s1 = int_to_ptr.vmem [resolvable:$true] %s126_s1  ;;  %s3961_s28 = int_to_ptr.vmem [resolvable:$true] %s42_s28 }
  0x36   :  { %s3671_s23 = scalar_lea.hbm %s4264_s19, 8192 }
  0x37   :  { %p3672_p2 = scmp.ne.s32.totalorder %s4264_s19, %s3671_s23  ;;  %p3675_p3 = scmp.lt.u32.totalorder %s3671_s23, %s4264_s19 }
  0x39   :  { %p3677_p4 = pnand %p3675_p3, %p3672_p2 }
  0x3b   :  { %3680 = shalt.err (!%p3677_p4)
}
  0x3c   :  { %s3681_s11 = scalar_lea.vmem %s127_s1, 8192  ;;  %p3686_p6 = scmp.lt.s32.totalorder %s127_s1, %s127_s1 }
  0x3d   :  { %p3682_p5 = scmp.ne.s32.totalorder %s127_s1, %s3681_s11  ;;  %p3687_p7 = scmp.lt.s32.totalorder %s3681_s11, %s3681_s11 }
  0x3f   :  { %p3688_p8 = por %p3687_p7, %p3686_p6 }
  0x41   :  { %p3689_p9 = pnand %p3688_p8, %p3682_p5 }
  0x43   :  { %3692 = shalt.err (!%p3689_p9)
}
  0x44   :  { %s3795_s27 = smov 256   ;;  %s3796_s26 = smov 16  }
  0x45   :  { %132 = dma.hbm_to_vmem [thread:$0]  %s4264_s19, 8192, %s127_s1, [#allocation11], %s3795_s27, %s3795_s27, %s3796_s26  }
  0x46   :  { %s4285_s29 = sld [smem:[#allocation19_spill]] }
  0x4c   :  { %s3693_s0 = scalar_lea.hbm %s4285_s29, 2048 }
  0x4d   :  { %p3694_p10 = scmp.ne.s32.totalorder %s4285_s29, %s3693_s0  ;;  %p3697_p11 = scmp.lt.u32.totalorder %s3693_s0, %s4285_s29 }
  0x4f   :  { %p3699_p12 = pnand %p3697_p11, %p3694_p10 }
  0x51   :  { %3702 = shalt.err (!%p3699_p12)
}
  0x52   :  { %s3703_s11 = scalar_lea.vmem %s3961_s28, 2048  ;;  %p3708_p0 = scmp.lt.s32.totalorder %s3961_s28, %s3961_s28 }
  0x53   :  { %p3704_p13 = scmp.ne.s32.totalorder %s3961_s28, %s3703_s11  ;;  %p3709_p1 = scmp.lt.s32.totalorder %s3703_s11, %s3703_s11 }
  0x55   :  { %p3710_p2 = por %p3709_p1, %p3708_p0 }
  0x57   :  { %p3711_p3 = pnand %p3710_p2, %p3704_p13 }
  0x59   :  { %3714 = shalt.err (!%p3711_p3)
}
  0x5a   :  { %48 = dma.hbm_to_vmem [thread:$0]  %s4285_s29, 2048, %s3961_s28, [#allocation3], %s3795_s27, %s3795_s27, %s3796_s26  }
  0x5b   :  { %s3797_s6 = smov [#allocation6]   ;;  %s4286_s0 = sld [smem:[#allocation25_spill]] }
  0x5c   :  { %s74_s4 = sshll.u32 %s3797_s6, 4  ;;  %s75_s4 = int_to_ptr.vmem [resolvable:$true] %s74_s4 }
  0x61   :  { %s3715_s23 = scalar_lea.hbm %s4286_s0, 2048 }
  0x62   :  { %p3716_p4 = scmp.ne.s32.totalorder %s4286_s0, %s3715_s23  ;;  %p3719_p5 = scmp.lt.u32.totalorder %s3715_s23, %s4286_s0 }
  0x64   :  { %p3721_p6 = pnand %p3719_p5, %p3716_p4 }
  0x66   :  { %3724 = shalt.err (!%p3721_p6)
}
  0x67   :  { %s3725_s25 = scalar_lea.vmem %s75_s4, 2048  ;;  %p3730_p8 = scmp.lt.s32.totalorder %s75_s4, %s75_s4 }
  0x68   :  { %p3726_p7 = scmp.ne.s32.totalorder %s75_s4, %s3725_s25  ;;  %p3731_p9 = scmp.lt.s32.totalorder %s3725_s25, %s3725_s25 }
  0x6a   :  { %p3732_p10 = por %p3731_p9, %p3730_p8 }
  0x6c   :  { %p3733_p11 = pnand %p3732_p10, %p3726_p7 }
  0x6e   :  { %3736 = shalt.err (!%p3733_p11)
}
  0x6f   :  { %s3798_s28 = smov 64   ;;  %s3799_s27 = smov 4  }
  0x70   :  { %80 = dma.hbm_to_vmem [thread:$0]  %s4286_s0, 2048, %s75_s4, [#allocation5], %s3798_s28, %s3798_s28, %s3799_s27  }
  0x71   :  { %s3800_s19 = smov [#allocation9]   ;;  %s3801_s6 = smov [#allocation12]  }
  0x72   :  { %s110_s1 = sshll.u32 %s3800_s19, 4  ;;  %s142_s5 = sshll.u32 %s3801_s6, 4  ;;  %s111_s1 = int_to_ptr.vmem [resolvable:$true] %s110_s1  ;;  %s143_s5 = int_to_ptr.vmem [resolvable:$true] %s142_s5 }
  0x73   :  { %s3737_s25 = scalar_lea.hbm %s4261_s16, 2048 }
  0x74   :  { %p3738_p12 = scmp.ne.s32.totalorder %s4261_s16, %s3737_s25  ;;  %p3741_p13 = scmp.lt.u32.totalorder %s3737_s25, %s4261_s16 }
  0x76   :  { %p3743_p0 = pnand %p3741_p13, %p3738_p12 }
  0x78   :  { %3746 = shalt.err (!%p3743_p0)
}
  0x79   :  { %s3747_s4 = scalar_lea.vmem %s111_s1, 2048  ;;  %p3752_p2 = scmp.lt.s32.totalorder %s111_s1, %s111_s1 }
  0x7a   :  { %p3748_p1 = scmp.ne.s32.totalorder %s111_s1, %s3747_s4  ;;  %p3753_p3 = scmp.lt.s32.totalorder %s3747_s4, %s3747_s4 }
  0x7c   :  { %p3754_p4 = por %p3753_p3, %p3752_p2 }
  0x7e   :  { %p3755_p5 = pnand %p3754_p4, %p3748_p1 }
  0x80   :  { %3758 = shalt.err (!%p3755_p5)
}
  0x81   :  { %s4287_s0 = smov 128   ;;  %s3759_s2 = scalar_lea.hbm %s4267_s22, 4096 }
  0x82   :  { %116 = dma.hbm_to_vmem [thread:$0]  %s4261_s16, 2048, %s111_s1, [#allocation8], %s4287_s0, %s4287_s0, %s3791_s8  }
  0x83   :  { %p3760_p6 = scmp.ne.s32.totalorder %s4267_s22, %s3759_s2  ;;  %p3763_p7 = scmp.lt.u32.totalorder %s3759_s2, %s4267_s22 }
  0x85   :  { %p3765_p8 = pnand %p3763_p7, %p3760_p6 }
  0x87   :  { %3768 = shalt.err (!%p3765_p8)
}
  0x88   :  { %s3769_s3 = scalar_lea.vmem %s143_s5, 4096  ;;  %p3774_p10 = scmp.lt.s32.totalorder %s143_s5, %s143_s5 }
  0x89   :  { %p3770_p9 = scmp.ne.s32.totalorder %s143_s5, %s3769_s3  ;;  %p3775_p11 = scmp.lt.s32.totalorder %s3769_s3, %s3769_s3 }
  0x8b   :  { %p3776_p12 = por %p3775_p11, %p3774_p10 }
  0x8d   :  { %p3777_p13 = pnand %p3776_p12, %p3770_p9 }
  0x8f   :  { %3780 = shalt.err (!%p3777_p13)
}
  0x90   :  { %148 = dma.hbm_to_vmem [thread:$0]  %s4267_s22, 4096, %s143_s5, [#allocation11], %s3798_s28, %s3798_s28, %s3799_s27  }
  0x91   :  { %3781 = dma.done.wait [#allocation3], 2048  }
  0x92   :  { %3782 = vsyncadd [#allocation3], 4294965248 }
  0x93   :  { %3783 = dma.done.wait [#allocation5], 10240  }
  0x94   :  { %3784 = vsyncadd [#allocation5], 4294957056 }
  0x95   :  { %3785 = dma.done.wait [#allocation8], 4096  }
  0x96   :  { %3786 = vsyncadd [#allocation8], 4294963200 }
  0x97   :  { %3787 = dma.done.wait [#allocation11], 12288  }
  0x98   :  { %3788 = vsyncadd [#allocation11], 4294955008  ;;  %v3802_v0 = vmov 0   ;;  %v3275_v1 = vld [vmem:[#allocation2 + $0x4] ss:$16 sps:$4 sm:$0xff]   ;;  %s4288_s27 = sld [smem:[#allocation17_spill]] }
  0x99   :  { %307 = vmatprep.mubr.bf16.mxu0 %v3802_v0  ;;  %348 = vmatprep.mubr.bf16.mxu1 %v3802_v0  ;;  %v3277_v2 = vld [vmem:[#allocation2 + $0xc] ss:$16 sps:$4 sm:$0xff]   ;;  %v3279_v3 = vld [vmem:[#allocation2] ss:$16 sps:$4 sm:$0xff]   ;;  %v3280_v4 = vld [vmem:[#allocation2 + $0x8] ss:$16 sps:$4 sm:$0xff]  }
  0x9a   :  { %275 = vmatprep.subr.bf16.mxu0 %v3275_v1  ;;  %316 = vmatprep.subr.bf16.mxu1 %v3277_v2  ;;  %v3281_v5 = vld [vmem:[#allocation2 + $0x24] ss:$16 sps:$4 sm:$0xff]   ;;  %v3283_v6 = vld [vmem:[#allocation2 + $0x2c] ss:$16 sps:$4 sm:$0xff]   ;;  %v3285_v7 = vld [vmem:[#allocation2 + $0x20] ss:$16 sps:$4 sm:$0xff]  }
  0x9b   :  { %276 = vmatpush1.bf16.msra.mxu0 %v3279_v3  ;;  %317 = vmatpush1.bf16.msra.mxu1 %v3280_v4  ;;  %v3286_v8 = vld [vmem:[#allocation2 + $0x28] ss:$16 sps:$4 sm:$0xff]   ;;  %v3287_v9 = vld [vmem:[#allocation2 + $0x44] ss:$16 sps:$4 sm:$0xff]   ;;  %v3289_v10 = vld [vmem:[#allocation2 + $0x4c] ss:$16 sps:$4 sm:$0xff]  }
  0x9c   :  { %277 = vmatprep.subr.bf16.mxu0 %v3281_v5  ;;  %318 = vmatprep.subr.bf16.mxu1 %v3283_v6  ;;  %v3291_v11 = vld [vmem:[#allocation2 + $0x40] ss:$16 sps:$4 sm:$0xff]   ;;  %v3292_v12 = vld [vmem:[#allocation2 + $0x48] ss:$16 sps:$4 sm:$0xff]   ;;  %v3293_v13 = vld [vmem:[#allocation2 + $0x64] ss:$16 sps:$4 sm:$0xff]  }
  0x9d   :  { %v3295_v14 = vld [vmem:[#allocation2 + $0x6c] ss:$16 sps:$4 sm:$0xff]   ;;  %v3297_v15 = vld [vmem:[#allocation2 + $0x60] ss:$16 sps:$4 sm:$0xff]   ;;  %v3298_v16 = vld [vmem:[#allocation2 + $0x68] ss:$16 sps:$4 sm:$0xff]  }
  0x9e   :  { %v173_v17 = vld [vmem:[%s4288_s27] sm:$0xff]  ;;  %vm271_vm0 = vcmask 523264   ;;  %v3304_v21 = vld [vmem:[#allocation4 + $0x14] ss:$8 sps:$4 sm:$0xff]   ;;  %v3302_v22 = vld [vmem:[#allocation4 + $0x10] ss:$8 sps:$4 sm:$0xff]  }
  0x9f   :  { %278 = vmatpush1.bf16.msra.mxu0 %v3285_v7  ;;  %319 = vmatpush1.bf16.msra.mxu1 %v3286_v8  ;;  %v174_v18 = vpack.c.bf16 %v173_v17, %v173_v17  ;;  %v3301_v19 = vld [vmem:[#allocation4 + $0x4] ss:$8 sps:$4 sm:$0xff]   ;;  %v3299_v20 = vld [vmem:[#allocation4] ss:$8 sps:$4 sm:$0xff]   ;;  %v3310_v25 = vld [vmem:[#allocation4 + $0x34] ss:$8 sps:$4 sm:$0xff]  }
  0xa0   :  { %279 = vmatprep.subr.bf16.mxu0 %v3287_v9  ;;  %320 = vmatprep.subr.bf16.mxu1 %v3289_v10  ;;  %v3307_v23 = vld [vmem:[#allocation4 + $0x24] ss:$8 sps:$4 sm:$0xff]   ;;  %v3305_v24 = vld [vmem:[#allocation4 + $0x20] ss:$8 sps:$4 sm:$0xff]   ;;  %v3308_v26 = vld [vmem:[#allocation4 + $0x30] ss:$8 sps:$4 sm:$0xff]  }
  0xa1   :  { %v3313_v27 = vld [vmem:[#allocation4 + $0x44] ss:$8 sps:$4 sm:$0xff]   ;;  %v3311_v28 = vld [vmem:[#allocation4 + $0x40] ss:$8 sps:$4 sm:$0xff]   ;;  %v3316_v29 = vld [vmem:[#allocation4 + $0x54] ss:$8 sps:$4 sm:$0xff]  }
  0xa2   :  { %v3314_v30 = vld [vmem:[#allocation4 + $0x50] ss:$8 sps:$4 sm:$0xff]   ;;  %v3319_v31 = vld [vmem:[#allocation4 + $0x64] ss:$8 sps:$4 sm:$0xff]   ;;  %v3317_v32 = vld [vmem:[#allocation4 + $0x60] ss:$8 sps:$4 sm:$0xff]  }
  0xa3   :  { %280 = vmatpush1.bf16.msra.mxu0 %v3291_v11  ;;  %321 = vmatpush1.bf16.msra.mxu1 %v3292_v12  ;;  %v3322_v33 = vld [vmem:[#allocation4 + $0x74] ss:$8 sps:$4 sm:$0xff]   ;;  %v3320_v34 = vld [vmem:[#allocation4 + $0x70] ss:$8 sps:$4 sm:$0xff]   ;;  %v3325_v35 = vld [vmem:[#allocation4 + $0x84] ss:$8 sps:$4 sm:$0xff]  }
  0xa4   :  { %281 = vmatprep.subr.bf16.mxu0 %v3293_v13  ;;  %322 = vmatprep.subr.bf16.mxu1 %v3295_v14  ;;  %v3323_v36 = vld [vmem:[#allocation4 + $0x80] ss:$8 sps:$4 sm:$0xff]   ;;  %v3328_v37 = vld [vmem:[#allocation4 + $0x94] ss:$8 sps:$4 sm:$0xff]   ;;  %v3326_v38 = vld [vmem:[#allocation4 + $0x90] ss:$8 sps:$4 sm:$0xff]  }
  0xa5   :  { %v3331_v39 = vld [vmem:[#allocation4 + $0xa4] ss:$8 sps:$4 sm:$0xff]   ;;  %v3329_v40 = vld [vmem:[#allocation4 + $0xa0] ss:$8 sps:$4 sm:$0xff]   ;;  %v3334_v41 = vld [vmem:[#allocation4 + $0xb4] ss:$8 sps:$4 sm:$0xff]  }
  0xa6   :  { %v3332_v42 = vld [vmem:[#allocation4 + $0xb0] ss:$8 sps:$4 sm:$0xff]   ;;  %v3335_v43 = vld [vmem:[#allocation4 + $0xc0] ss:$8 sps:$4 sm:$0xff]   ;;  %v3337_v44 = vld [vmem:[#allocation4 + $0xc4] ss:$8 sps:$4 sm:$0xff]  }
  0xa7   :  { %282 = vmatpush1.bf16.msra.mxu0 %v3297_v15  ;;  %323 = vmatpush1.bf16.msra.mxu1 %v3298_v16  ;;  %v3340_v45 = vld [vmem:[#allocation4 + $0xd4] ss:$8 sps:$4 sm:$0xff]   ;;  %v3338_v46 = vld [vmem:[#allocation4 + $0xd0] ss:$8 sps:$4 sm:$0xff]   ;;  %v3343_v47 = vld [vmem:[#allocation4 + $0xe4] ss:$8 sps:$4 sm:$0xff]  }
  0xa8   :  { %945 = vmatprep.subr.bf16.mxu0 %v3301_v19  ;;  %v3341_v48 = vld [vmem:[#allocation4 + $0xe0] ss:$8 sps:$4 sm:$0xff]   ;;  %v3346_v49 = vld [vmem:[#allocation4 + $0xf4] ss:$8 sps:$4 sm:$0xff]   ;;  %v3344_v50 = vld [vmem:[#allocation4 + $0xf0] ss:$8 sps:$4 sm:$0xff]  }
  0xa9   :  { %v3349_v51 = vld [vmem:[#allocation4 + $0x104] ss:$8 sps:$4 sm:$0xff]   ;;  %s4289_s11 = sld [smem:[#allocation20_spill]]  ;;  %s4290_s26 = sld [smem:[#allocation21_spill]]  ;;  %vm3805_vm1 = vmmov 0  }
  0xaa   :  { %2940 = vmatmul.mubr.msk.bf16.vlgmr.msra.gmra.mrb[0].mxu0 %vm271_vm0, %v174_v18  ;;  %2941 = vmatmul.mubr.msk.bf16.vlgmr.msra.gmra.mrb[0].mxu1 %vm271_vm0, %v174_v18  ;;  %s4291_s6 = sld [smem:[#allocation23_spill]]  ;;  %s4292_s25 = sld [smem:[#allocation24_spill]] }
  0xab   :  { %946 = vmatpush1.bf16.msra.mxu0 %v3299_v20  ;;  %s4293_s8 = sld [smem:[#allocation18_spill]] }
  0xac   :  { %947 = vmatprep.subr.bf16.mxu0 %v3304_v21 }
  0xaf   :  { %948 = vmatpush1.bf16.msra.mxu0 %v3302_v22 }
  0xb0   :  { %949 = vmatprep.subr.bf16.mxu0 %v3307_v23 }
  0xb3   :  { %950 = vmatpush1.bf16.msra.mxu0 %v3305_v24 }
  0xb4   :  { %951 = vmatprep.subr.bf16.mxu0 %v3310_v25 }
  0xb7   :  { %952 = vmatpush1.bf16.msra.mxu0 %v3308_v26 }
  0xb8   :  { %953 = vmatprep.subr.bf16.mxu0 %v3313_v27 }
  0xbb   :  { %954 = vmatpush1.bf16.msra.mxu0 %v3311_v28 }
  0xbc   :  { %955 = vmatprep.subr.bf16.mxu0 %v3316_v29 }
  0xbf   :  { %956 = vmatpush1.bf16.msra.mxu0 %v3314_v30 }
  0xc0   :  { %957 = vmatprep.subr.bf16.mxu0 %v3319_v31 }
  0xc3   :  { %958 = vmatpush1.bf16.msra.mxu0 %v3317_v32 }
  0xc4   :  { %959 = vmatprep.subr.bf16.mxu0 %v3322_v33 }
  0xc7   :  { %960 = vmatpush1.bf16.msra.mxu0 %v3320_v34 }
  0xc8   :  { %961 = vmatprep.subr.bf16.mxu0 %v3325_v35 }
  0xcb   :  { %962 = vmatpush1.bf16.msra.mxu0 %v3323_v36 }
  0xcc   :  { %963 = vmatprep.subr.bf16.mxu0 %v3328_v37 }
  0xcf   :  { %964 = vmatpush1.bf16.msra.mxu0 %v3326_v38 }
  0xd0   :  { %965 = vmatprep.subr.bf16.mxu0 %v3331_v39 }
  0xd3   :  { %966 = vmatpush1.bf16.msra.mxu0 %v3329_v40 }
  0xd4   :  { %967 = vmatprep.subr.bf16.mxu0 %v3334_v41 }
  0xd7   :  { %968 = vmatpush1.bf16.msra.mxu0 %v3332_v42 }
  0xd8   :  { %969 = vmatprep.subr.bf16.mxu0 %v3337_v44 }
  0xdb   :  { %970 = vmatpush1.bf16.msra.mxu0 %v3335_v43 }
  0xdc   :  { %971 = vmatprep.subr.bf16.mxu0 %v3340_v45 }
  0xdf   :  { %972 = vmatpush1.bf16.msra.mxu0 %v3338_v46 }
  0xe0   :  { %973 = vmatprep.subr.bf16.mxu0 %v3343_v47 }
  0xe3   :  { %974 = vmatpush1.bf16.msra.mxu0 %v3341_v48 }
  0xe4   :  { %975 = vmatprep.subr.bf16.mxu0 %v3346_v49 }
  0xe7   :  { %976 = vmatpush1.bf16.msra.mxu0 %v3344_v50 }
  0xe8   :  { %986 = vmatprep.subr.bf16.mxu0 %v3349_v51 }
 0x17d   :  { %v4042_v52 = vpop.f32.mrb[0].mxu0  ;;  %v4044_v53 = vpop.f32.mrb[0].mxu1 }
 0x17e   :  { %v357_v54 = vrot.slane %v4042_v52, 4  ;;  %v385_v55 = vmul.f32 %v4042_v52, %v4042_v52  ;;  %v369_v56 = vrot.slane %v4044_v53, 4  ;;  %v387_v57 = vmul.f32 %v4044_v53, %v4044_v53  ;;  %v4052_v58 = vpop.f32.mrb[1].mxu0  ;;  %v4054_v59 = vpop.f32.mrb[1].mxu1 }
 0x17f   :  { %v363_v60 = vrot.slane %v4052_v58, 4  ;;  %v386_v61 = vmul.f32 %v4052_v58, %v4052_v58  ;;  %v375_v62 = vrot.slane %v4054_v59, 4  ;;  %v388_v63 = vmul.f32 %v4054_v59, %v4054_v59  ;;  %v313_v1 = vpop.f32.mrb[2].mxu0  ;;  %v354_v2 = vpop.f32.mrb[2].mxu1 }
 0x180   :  { %v358_v3 = vadd.f32 %v357_v54, %v4042_v52  ;;  %v389_v4 = vrot.slane %v385_v55, 4  ;;  %v370_v5 = vadd.f32 %v369_v56, %v4044_v53  ;;  %v401_v6 = vrot.slane %v387_v57, 4  ;;  %v314_v7 = vpop.f32.mrb[3].mxu0  ;;  %v355_v8 = vpop.f32.mrb[3].mxu1 }
 0x181   :  { %v364_v9 = vadd.f32 %v363_v60, %v4052_v58  ;;  %v395_v10 = vrot.slane %v386_v61, 4  ;;  %v376_v11 = vadd.f32 %v375_v62, %v4054_v59  ;;  %v407_v12 = vrot.slane %v388_v63, 4 }
 0x182   :  { %v359_v13 = vrot.slane %v358_v3, 2  ;;  %v390_v14 = vadd.f32 %v389_v4, %v385_v55  ;;  %v371_v15 = vrot.slane %v370_v5, 2  ;;  %v402_v16 = vadd.f32 %v401_v6, %v387_v57 }
 0x183   :  { %v365_v17 = vrot.slane %v364_v9, 2  ;;  %v396_v18 = vadd.f32 %v395_v10, %v386_v61  ;;  %v377_v19 = vrot.slane %v376_v11, 2  ;;  %v408_v20 = vadd.f32 %v407_v12, %v388_v63 }
 0x184   :  { %v360_v21 = vadd.f32 %v359_v13, %v358_v3  ;;  %v391_v22 = vrot.slane %v390_v14, 2  ;;  %v372_v23 = vadd.f32 %v371_v15, %v370_v5  ;;  %v403_v24 = vrot.slane %v402_v16, 2 }
 0x185   :  { %v366_v25 = vadd.f32 %v365_v17, %v364_v9  ;;  %v397_v26 = vrot.slane %v396_v18, 2  ;;  %v378_v27 = vadd.f32 %v377_v19, %v376_v11  ;;  %v409_v28 = vrot.slane %v408_v20, 2 }
 0x186   :  { %v361_v29 = vrot.slane %v360_v21, 1  ;;  %v392_v30 = vadd.f32 %v391_v22, %v390_v14  ;;  %v373_v31 = vrot.slane %v372_v23, 1  ;;  %v404_v32 = vadd.f32 %v403_v24, %v402_v16 }
 0x187   :  { %v367_v33 = vrot.slane %v366_v25, 1  ;;  %v398_v34 = vadd.f32 %v397_v26, %v396_v18  ;;  %v379_v35 = vrot.slane %v378_v27, 1  ;;  %v410_v36 = vadd.f32 %v409_v28, %v408_v20 }
 0x188   :  { %v362_v37 = vadd.f32 %v361_v29, %v360_v21  ;;  %v393_v38 = vrot.slane %v392_v30, 1  ;;  %v374_v39 = vadd.f32 %v373_v31, %v372_v23  ;;  %v405_v40 = vrot.slane %v404_v32, 1 }
 0x189   :  { %v368_v41 = vadd.f32 %v367_v33, %v366_v25  ;;  %v399_v42 = vrot.slane %v398_v34, 1  ;;  %v380_v43 = vadd.f32 %v379_v35, %v378_v27  ;;  %v411_v44 = vrot.slane %v410_v36, 1  ;;  %v425_v25 = vld [vmem:[%s4289_s11] sm:$0xf] }
 0x18a   :  { %v381_v45 = vmul.f32 0.125, %v362_v37  ;;  %v394_v46 = vadd.f32 %v393_v38, %v392_v30  ;;  %v383_v47 = vmul.f32 0.125, %v374_v39  ;;  %v406_v48 = vadd.f32 %v405_v40, %v404_v32 }
 0x18b   :  { %v382_v49 = vmul.f32 0.125, %v368_v41  ;;  %v400_v50 = vadd.f32 %v399_v42, %v398_v34  ;;  %v384_v51 = vmul.f32 0.125, %v380_v43  ;;  %v412_v54 = vadd.f32 %v411_v44, %v410_v36 }
 0x18c   :  { %v413_v55 = vmul.f32 0.125, %v394_v46  ;;  %v417_v56 = vmul.f32 %v381_v45, %v381_v45  ;;  %v415_v57 = vmul.f32 0.125, %v406_v48  ;;  %v419_v60 = vmul.f32 %v383_v47, %v383_v47 }
 0x18d   :  { %v414_v61 = vmul.f32 0.125, %v400_v50  ;;  %v418_v62 = vmul.f32 %v382_v49, %v382_v49  ;;  %v416_v63 = vmul.f32 0.125, %v412_v54  ;;  %v420_v1 = vmul.f32 %v384_v51, %v384_v51 }
 0x18e   :  { %v421_v2 = vsub.f32 %v413_v55, %v417_v56  ;;  %v423_v3 = vsub.f32 %v415_v57, %v419_v60  ;;  %v3803_v10 = vmov 1966171168   ;;  %v443_v12 = vlaneseq }
 0x18f   :  { %v422_v4 = vsub.f32 %v414_v61, %v418_v62  ;;  %v424_v5 = vsub.f32 %v416_v63, %v420_v1  ;;  %v441_v11 = vunpack.c.l.s4 %v3803_v10  ;;  %v3353_v10 = vld [vmem:[#allocation4 + $0x120] ss:$8 sps:$4 sm:$0xff]  }
 0x190   :  { %v426_v6 = vadd.f32 1e-05, %v421_v2  ;;  %v428_v7 = vadd.f32 1e-05, %v423_v3  ;;  %v444_v14 = vshrl.u32 %v443_v12, 7 }
 0x191   :  { %v427_v8 = vadd.f32 1e-05, %v422_v4  ;;  %v429_v9 = vadd.f32 1e-05, %v424_v5  ;;  %v442_v13 = vunpack.c.0.s8 %v441_v11  ;;  %v3347_v4 = vld [vmem:[#allocation4 + $0x100] ss:$8 sps:$4 sm:$0xff]  }
 0x192   :  { %3595 = vrsqrt.f32 %v426_v6  ;;  %v4073_v26 = vsub.s32 0, %v444_v14  ;;  %v4076_v28 = vsub.s32 1, %v444_v14  ;;  %v4078_v29 = vsub.s32 2, %v444_v14  ;;  %v3352_v6 = vld [vmem:[#allocation4 + $0x114] ss:$8 sps:$4 sm:$0xff]  }
 0x193   :  { %3597 = vrsqrt.f32 %v428_v7  ;;  %v4066_v17 = vsub.s32 %v442_v13, %v444_v14  ;;  %v4080_v30 = vsub.s32 3, %v444_v14  ;;  %v3358_v11 = vld [vmem:[#allocation4 + $0x134] ss:$8 sps:$4 sm:$0xff]   ;;  %v3356_v12 = vld [vmem:[#allocation4 + $0x130] ss:$8 sps:$4 sm:$0xff]  }
 0x194   :  { %3599 = vrsqrt.f32 %v427_v8  ;;  %v3350_v8 = vld [vmem:[#allocation4 + $0x110] ss:$8 sps:$4 sm:$0xff]   ;;  %v3361_v13 = vld [vmem:[#allocation4 + $0x144] ss:$8 sps:$4 sm:$0xff]   ;;  %v3359_v14 = vld [vmem:[#allocation4 + $0x140] ss:$8 sps:$4 sm:$0xff]  }
 0x195   :  { %3601 = vrsqrt.f32 %v429_v9  ;;  %v3355_v9 = vld [vmem:[#allocation4 + $0x124] ss:$8 sps:$4 sm:$0xff]  }
 0x19c   :  { %v3596_v15 = vpop.eup %3595 }
 0x19d   :  { %v3598_v16 = vpop.eup %3597 }
 0x19e   :  { %v3600_v18 = vpop.eup %3599 }
 0x19f   :  { %v3602_v19 = vpop.eup %3601  ;;  %v438_v20 = vcombine.low %v3596_v15, %v3600_v18  ;;  %v3364_v15 = vld [vmem:[#allocation4 + $0x154] ss:$8 sps:$4 sm:$0xff]   ;;  %v3367_v18 = vld [vmem:[#allocation4 + $0x164] ss:$8 sps:$4 sm:$0xff]  }
 0x1a0   :  { %v439_v21 = vcombine.low %v3598_v16, %v3602_v19  ;;  %v3362_v16 = vld [vmem:[#allocation4 + $0x150] ss:$8 sps:$4 sm:$0xff]   ;;  %v3365_v19 = vld [vmem:[#allocation4 + $0x160] ss:$8 sps:$4 sm:$0xff]  }
 0x1a1   :  { %v446_v22 = vrot.slane %v438_v20, %v4066_v17  ;;  %v3370_v20 = vld [vmem:[#allocation4 + $0x174] ss:$8 sps:$4 sm:$0xff]  }
 0x1a2   :  { %v453_v23 = vrot.slane %v439_v21, %v4066_v17  ;;  %v3368_v21 = vld [vmem:[#allocation4 + $0x170] ss:$8 sps:$4 sm:$0xff]  }
 0x1a4   :  { %v454_v24 = vcombine.low %v446_v22, %v453_v23  ;;  %v3373_v22 = vld [vmem:[#allocation4 + $0x184] ss:$8 sps:$4 sm:$0xff]   ;;  %v3371_v23 = vld [vmem:[#allocation4 + $0x180] ss:$8 sps:$4 sm:$0xff]  }
 0x1a6   :  { %v461_v27 = vrot.slane %v454_v24, %v4066_v17  ;;  %v3376_v24 = vld [vmem:[#allocation4 + $0x194] ss:$8 sps:$4 sm:$0xff]  }
 0x1a8   :  { %v463_v31 = vmul.f32 %v461_v27, %v425_v25  ;;  %v3374_v25 = vld [vmem:[#allocation4 + $0x190] ss:$8 sps:$4 sm:$0xff]   ;;  %v3379_v27 = vld [vmem:[#allocation4 + $0x1a4] ss:$8 sps:$4 sm:$0xff]  }
 0x1aa   :  { %v477_v32 = vrot.slane %v463_v31, %v4078_v29  ;;  %v481_v33 = vrot.slane %v463_v31, %v4080_v30  ;;  %v469_v34 = vrot.slane %v463_v31, %v4073_v26  ;;  %v473_v35 = vrot.slane %v463_v31, %v4076_v28  ;;  %v3377_v31 = vld [vmem:[#allocation4 + $0x1a0] ss:$8 sps:$4 sm:$0xff]  }
 0x1ac   :  { %v488_v36 = vmul.f32 %v477_v32, %v383_v47  ;;  %v489_v37 = vmul.f32 %v481_v33, %v384_v51  ;;  %v523_v38 = vmul.f32 %v481_v33, %v4054_v59  ;;  %v486_v39 = vmul.f32 %v469_v34, %v381_v45  ;;  %v464_v47 = vld [vmem:[%s4290_s26] sm:$0xf]  ;;  %v3380_v33 = vld [vmem:[#allocation4 + $0x1b0] ss:$8 sps:$4 sm:$0xff]   ;;  %s4294_s26 = sld [smem:[#allocation26_spill]] }
 0x1ad   :  { %v487_v40 = vmul.f32 %v473_v35, %v382_v49  ;;  %v521_v41 = vmul.f32 %v473_v35, %v4052_v58  ;;  %v520_v42 = vmul.f32 %v469_v34, %v4042_v52  ;;  %v522_v43 = vmul.f32 %v477_v32, %v4044_v53  ;;  %v3382_v32 = vld [vmem:[#allocation4 + $0x1b4] ss:$8 sps:$4 sm:$0xff]   ;;  %v3385_v34 = vld [vmem:[#allocation4 + $0x1c4] ss:$8 sps:$4 sm:$0xff]   ;;  %v3383_v35 = vld [vmem:[#allocation4 + $0x1c0] ss:$8 sps:$4 sm:$0xff]  }
 0x1ae   :  { %v495_v44 = vcombine.low %v488_v36, %v489_v37  ;;  %v3388_v36 = vld [vmem:[#allocation4 + $0x1d4] ss:$8 sps:$4 sm:$0xff]   ;;  %v3386_v37 = vld [vmem:[#allocation4 + $0x1d0] ss:$8 sps:$4 sm:$0xff]  }
 0x1af   :  { %v494_v46 = vcombine.low %v486_v39, %v487_v40  ;;  %v3389_v39 = vld [vmem:[#allocation4 + $0x1e0] ss:$8 sps:$4 sm:$0xff]   ;;  %v3394_v40 = vld [vmem:[#allocation4 + $0x1f4] ss:$8 sps:$4 sm:$0xff]  }
 0x1b0   :  { %v509_v48 = vrot.slane %v495_v44, %v4066_v17 }
 0x1b1   :  { %v502_v50 = vrot.slane %v494_v46, %v4066_v17  ;;  %v3395_v46 = vld [vmem:[#allocation6 + $0x40] sm:$0xff]  }
 0x1b2   :  { %3159 = vmatprep.subr.bf16.mxu1 %v3395_v46 }
 0x1b3   :  { %v510_v54 = vcombine.low %v502_v50, %v509_v48  ;;  %v3396_v48 = vld [vmem:[#allocation6] sm:$0xff]   ;;  %v3397_v50 = vld [vmem:[#allocation6 + $0x48] sm:$0xff]  }
 0x1b4   :  { %3160 = vmatpush3.bf16.msra.mxu1 %v3396_v48 }
 0x1b5   :  { %v517_v59 = vrot.slane %v510_v54, %v4066_v17  ;;  %v3398_v54 = vld [vmem:[#allocation6 + $0x8] sm:$0xff]   ;;  %3161 = vmatprep.subr.bf16.mxu1 %v3397_v50  ;;  %v1061_v50 = vld [vmem:[%s4291_s6] sm:$0x3] }
 0x1b7   :  { %v519_v45 = vsub.f32 %v464_v47, %v517_v59  ;;  %v3399_v47 = vld [vmem:[#allocation6 + $0x50] sm:$0xff]  }
 0x1b8   :  { %3162 = vmatpush3.bf16.msra.mxu1 %v3398_v54  ;;  %v3400_v59 = vld [vmem:[#allocation6 + $0x10] sm:$0xff]  }
 0x1b9   :  { %v532_v58 = vrot.slane %v519_v45, %v4076_v28  ;;  %v528_v52 = vrot.slane %v519_v45, %v4073_v26  ;;  %v540_v53 = vrot.slane %v519_v45, %v4080_v30  ;;  %v536_v49 = vrot.slane %v519_v45, %v4078_v29  ;;  %3163 = vmatprep.subr.bf16.mxu1 %v3399_v47  ;;  %v3401_v45 = vld [vmem:[#allocation6 + $0x58] sm:$0xff]  }
 0x1bb   :  { %v546_v51 = vadd.f32 %v532_v58, %v521_v41  ;;  %v545_v55 = vadd.f32 %v528_v52, %v520_v42  ;;  %v548_v56 = vadd.f32 %v540_v53, %v523_v38  ;;  %v4100_v57 = vadd.f32 %v536_v49, %v522_v43  ;;  %v3391_v38 = vld [vmem:[#allocation4 + $0x1e4] ss:$8 sps:$4 sm:$0xff]   ;;  %v3392_v42 = vld [vmem:[#allocation4 + $0x1f0] ss:$8 sps:$4 sm:$0xff]  }
 0x1bc   :  { %3164 = vmatpush3.bf16.msra.mxu1 %v3400_v59  ;;  %v3402_v58 = vld [vmem:[#allocation6 + $0x18] sm:$0xff]   ;;  %v3403_v52 = vld [vmem:[#allocation6 + $0x60] sm:$0xff]   ;;  %v3405_v49 = vld [vmem:[#allocation6 + $0x68] sm:$0xff]  }
 0x1bd   :  { %v550_v60 = vmul.f32 0.01, %v546_v51  ;;  %v549_v61 = vmul.f32 0.01, %v545_v55  ;;  %v552_v62 = vmul.f32 0.01, %v548_v56  ;;  %3165 = vmatprep.subr.bf16.mxu1 %v3401_v45 }
 0x1be   :  { %v551_v41 = vmul.f32 0.01, %v4100_v57  ;;  %v3404_v53 = vld [vmem:[#allocation6 + $0x20] sm:$0xff]  }
 0x1bf   :  { %v554_v63 = vmax.f32 %v546_v51, %v550_v60  ;;  %v553_v1 = vmax.f32 %v545_v55, %v549_v61  ;;  %v556_v2 = vmax.f32 %v548_v56, %v552_v62  ;;  %v3406_v51 = vld [vmem:[#allocation6 + $0x28] sm:$0xff]   ;;  %v3407_v55 = vld [vmem:[#allocation6 + $0x70] sm:$0xff]   ;;  %v3410_v60 = vld [vmem:[#allocation6 + $0x38] sm:$0xff]  }
 0x1c0   :  { %v555_v43 = vmax.f32 %v4100_v57, %v551_v41  ;;  %3166 = vmatpush3.bf16.msra.mxu1 %v3402_v58  ;;  %v3408_v56 = vld [vmem:[#allocation6 + $0x30] sm:$0xff]   ;;  %v3409_v57 = vld [vmem:[#allocation6 + $0x78] sm:$0xff]  }
 0x1c1   :  { %v558_v3 = vpack.c.bf16 %v554_v63, %v554_v63  ;;  %v557_v5 = vpack.c.bf16 %v553_v1, %v553_v1  ;;  %v560_v7 = vpack.c.bf16 %v556_v2, %v556_v2  ;;  %3167 = vmatprep.subr.bf16.mxu1 %v3403_v52 }
 0x1c2   :  { %v559_v44 = vpack.c.bf16 %v555_v43, %v555_v43 }
 0x1c3   :  { %977 = vmatprep.mubr.bf16.mxu0 %v558_v3 }
 0x1c4   :  { %978 = vmatmul.mubr.bf16.vlgmr.msra.gmra.mrb[4].mxu0 %v557_v5  ;;  %3168 = vmatpush3.bf16.msra.mxu1 %v3404_v53 }
 0x1c5   :  { %987 = vmatpush1.bf16.msra.mxu0 %v3347_v4  ;;  %1018 = vmatprep.mubr.bf16.mxu0 %v560_v7 }
 0x1c6   :  { %988 = vmatprep.subr.bf16.mxu0 %v3352_v6  ;;  %3169 = vmatprep.subr.bf16.mxu1 %v3405_v49 }
 0x1c8   :  { %3170 = vmatpush3.bf16.msra.mxu1 %v3406_v51 }
 0x1c9   :  { %989 = vmatpush1.bf16.msra.mxu0 %v3350_v8  ;;  %3171 = vmatprep.subr.bf16.mxu1 %v3407_v55 }
 0x1ca   :  { %990 = vmatprep.subr.bf16.mxu0 %v3355_v9 }
 0x1cc   :  { %3172 = vmatpush3.bf16.msra.mxu1 %v3408_v56  ;;  %v1085_v56 = vld [vmem:[%s4292_s25] sm:$0x3] }
 0x1cd   :  { %991 = vmatpush1.bf16.msra.mxu0 %v3353_v10  ;;  %3173 = vmatprep.subr.bf16.mxu1 %v3409_v57 }
 0x1ce   :  { %992 = vmatprep.subr.bf16.mxu0 %v3358_v11 }
 0x1d0   :  { %3174 = vmatpush3.bf16.msra.mxu1 %v3410_v60 }
 0x1d1   :  { %993 = vmatpush1.bf16.msra.mxu0 %v3356_v12 }
 0x1d2   :  { %994 = vmatprep.subr.bf16.mxu0 %v3361_v13 }
 0x1d5   :  { %995 = vmatpush1.bf16.msra.mxu0 %v3359_v14 }
 0x1d6   :  { %996 = vmatprep.subr.bf16.mxu0 %v3364_v15 }
 0x1d9   :  { %997 = vmatpush1.bf16.msra.mxu0 %v3362_v16 }
 0x1da   :  { %998 = vmatprep.subr.bf16.mxu0 %v3367_v18 }
 0x1dd   :  { %999 = vmatpush1.bf16.msra.mxu0 %v3365_v19 }
 0x1de   :  { %1000 = vmatprep.subr.bf16.mxu0 %v3370_v20 }
 0x1e1   :  { %1001 = vmatpush1.bf16.msra.mxu0 %v3368_v21 }
 0x1e2   :  { %1002 = vmatprep.subr.bf16.mxu0 %v3373_v22 }
 0x1e5   :  { %1003 = vmatpush1.bf16.msra.mxu0 %v3371_v23 }
 0x1e6   :  { %1004 = vmatprep.subr.bf16.mxu0 %v3376_v24 }
 0x1e9   :  { %1005 = vmatpush1.bf16.msra.mxu0 %v3374_v25 }
 0x1ea   :  { %1006 = vmatprep.subr.bf16.mxu0 %v3379_v27 }
 0x1ed   :  { %1007 = vmatpush1.bf16.msra.mxu0 %v3377_v31 }
 0x1ee   :  { %1008 = vmatprep.subr.bf16.mxu0 %v3382_v32 }
 0x1f1   :  { %1009 = vmatpush1.bf16.msra.mxu0 %v3380_v33 }
 0x1f2   :  { %1010 = vmatprep.subr.bf16.mxu0 %v3385_v34 }
 0x1f5   :  { %1011 = vmatpush1.bf16.msra.mxu0 %v3383_v35 }
 0x1f6   :  { %1012 = vmatprep.subr.bf16.mxu0 %v3388_v36 }
 0x1f9   :  { %1013 = vmatpush1.bf16.msra.mxu0 %v3386_v37 }
 0x1fa   :  { %1014 = vmatprep.subr.bf16.mxu0 %v3391_v38 }
 0x1fd   :  { %1015 = vmatpush1.bf16.msra.mxu0 %v3389_v39 }
 0x1fe   :  { %1016 = vmatprep.subr.bf16.mxu0 %v3394_v40 }
 0x201   :  { %1017 = vmatpush1.bf16.msra.mxu0 %v3392_v42 }
 0x204   :  { %1019 = vmatmul.mubr.bf16.vlgmr.msra.gmra.mrb[4].mxu0 %v559_v44 }
 0x2d7   :  { %v1020_v61 = vpop.f32.mrb[4].mxu0 }
 0x2d8   :  { %v1027_v62 = vrot.slane %v1020_v61, 4  ;;  %v1041_v63 = vmul.f32 %v1020_v61, %v1020_v61  ;;  %v1022_v1 = vpop.f32.mrb[5].mxu0 }
 0x2d9   :  { %v1033_v2 = vrot.slane %v1022_v1, 4  ;;  %v1042_v3 = vmul.f32 %v1022_v1, %v1022_v1  ;;  %v1024_v4 = vpop.f32.mrb[6].mxu0 }
 0x2da   :  { %v1028_v5 = vadd.f32 %v1027_v62, %v1020_v61  ;;  %v1043_v6 = vrot.slane %v1041_v63, 4  ;;  %v1025_v7 = vpop.f32.mrb[7].mxu0 }
 0x2db   :  { %v1034_v8 = vadd.f32 %v1033_v2, %v1022_v1  ;;  %v1049_v9 = vrot.slane %v1042_v3, 4 }
 0x2dc   :  { %v1029_v10 = vrot.slane %v1028_v5, 2  ;;  %v1044_v11 = vadd.f32 %v1043_v6, %v1041_v63 }
 0x2dd   :  { %v1035_v12 = vrot.slane %v1034_v8, 2  ;;  %v1050_v13 = vadd.f32 %v1049_v9, %v1042_v3  ;;  %v3411_v9 = vld [vmem:[#allocation7] ss:$8 sps:$4 sm:$0xff]  }
 0x2de   :  { %v1030_v14 = vadd.f32 %v1029_v10, %v1028_v5  ;;  %v1045_v15 = vrot.slane %v1044_v11, 2  ;;  %v3416_v10 = vld [vmem:[#allocation7 + $0x14] ss:$8 sps:$4 sm:$0xff]  }
 0x2df   :  { %v1036_v16 = vadd.f32 %v1035_v12, %v1034_v8  ;;  %v1051_v18 = vrot.slane %v1050_v13, 2  ;;  %v3413_v8 = vld [vmem:[#allocation7 + $0x4] ss:$8 sps:$4 sm:$0xff]  }
 0x2e0   :  { %v1031_v19 = vrot.slane %v1030_v14, 1  ;;  %v1046_v20 = vadd.f32 %v1045_v15, %v1044_v11  ;;  %1456 = vmatprep.subr.bf16.mxu1 %v3413_v8  ;;  %v3414_v11 = vld [vmem:[#allocation7 + $0x10] ss:$8 sps:$4 sm:$0xff]   ;;  %v3419_v12 = vld [vmem:[#allocation7 + $0x24] ss:$8 sps:$4 sm:$0xff]  }
 0x2e1   :  { %v1037_v21 = vrot.slane %v1036_v16, 1  ;;  %v1052_v22 = vadd.f32 %v1051_v18, %v1050_v13  ;;  %v3417_v13 = vld [vmem:[#allocation7 + $0x20] ss:$8 sps:$4 sm:$0xff]   ;;  %v3420_v15 = vld [vmem:[#allocation7 + $0x30] ss:$8 sps:$4 sm:$0xff]  }
 0x2e2   :  { %v1032_v23 = vadd.f32 %v1031_v19, %v1030_v14  ;;  %v1047_v24 = vrot.slane %v1046_v20, 1  ;;  %v3422_v14 = vld [vmem:[#allocation7 + $0x34] ss:$8 sps:$4 sm:$0xff]   ;;  %v3423_v18 = vld [vmem:[#allocation7 + $0x40] ss:$8 sps:$4 sm:$0xff]  }
 0x2e3   :  { %v1038_v25 = vadd.f32 %v1037_v21, %v1036_v16  ;;  %v1053_v27 = vrot.slane %v1052_v22, 1  ;;  %v3425_v16 = vld [vmem:[#allocation7 + $0x44] ss:$8 sps:$4 sm:$0xff]   ;;  %v3428_v19 = vld [vmem:[#allocation7 + $0x54] ss:$8 sps:$4 sm:$0xff]  }
 0x2e4   :  { %v1039_v31 = vmul.f32 0.125, %v1032_v23  ;;  %v1048_v32 = vadd.f32 %v1047_v24, %v1046_v20  ;;  %v3426_v20 = vld [vmem:[#allocation7 + $0x50] ss:$8 sps:$4 sm:$0xff]   ;;  %v3431_v21 = vld [vmem:[#allocation7 + $0x64] ss:$8 sps:$4 sm:$0xff]  }
 0x2e5   :  { %v1040_v33 = vmul.f32 0.125, %v1038_v25  ;;  %v1054_v34 = vadd.f32 %v1053_v27, %v1052_v22  ;;  %v3429_v22 = vld [vmem:[#allocation7 + $0x60] ss:$8 sps:$4 sm:$0xff]   ;;  %v3434_v23 = vld [vmem:[#allocation7 + $0x74] ss:$8 sps:$4 sm:$0xff]   ;;  %v3804_v25 = vmov 0.0  }
 0x2e6   :  { %v1055_v35 = vmul.f32 0.125, %v1048_v32  ;;  %v1057_v36 = vmul.f32 %v1039_v31, %v1039_v31  ;;  %v3432_v24 = vld [vmem:[#allocation7 + $0x70] ss:$8 sps:$4 sm:$0xff]   ;;  %v3440_v8 = vld [vmem:[%s4258_s13 + $0x28] sm:$0xff]  }
 0x2e7   :  { %v1056_v37 = vmul.f32 0.125, %v1054_v34  ;;  %v1058_v38 = vmul.f32 %v1040_v33, %v1040_v33 }
 0x2e8   :  { %v1059_v39 = vsub.f32 %v1055_v35, %v1057_v36 }
 0x2e9   :  { %v1060_v40 = vsub.f32 %v1056_v37, %v1058_v38 }
 0x2ea   :  { %v1062_v41 = vadd.f32 1e-05, %v1059_v39 }
 0x2eb   :  { %v1063_v42 = vadd.f32 1e-05, %v1060_v40 }
 0x2ec   :  { %3603 = vrsqrt.f32 %v1062_v41 }
 0x2ed   :  { %3605 = vrsqrt.f32 %v1063_v42 }
 0x2f6   :  { %v3604_v43 = vpop.eup %3603 }
 0x2f7   :  { %v3606_v44 = vpop.eup %3605 }
 0x2f8   :  { %v1068_v46 = vcombine.low %v3604_v43, %v3606_v44 }
 0x2fa   :  { %v1075_v48 = vrot.slane %v1068_v46, %v4066_v17 }
 0x2fc   :  { %v1082_v54 = vrot.slane %v1075_v48, %v4066_v17 }
 0x2fe   :  { %v1084_v47 = vmul.f32 %v1082_v54, %v1061_v50 }
 0x300   :  { %v1090_v59 = vrot.slane %v1084_v47, %v4073_v26  ;;  %v1094_v45 = vrot.slane %v1084_v47, %v4076_v28 }
 0x302   :  { %v1097_v58 = vmul.f32 %v1090_v59, %v1039_v31  ;;  %v1098_v52 = vmul.f32 %v1094_v45, %v1040_v33  ;;  %v1119_v53 = vmul.f32 %v1094_v45, %v1022_v1  ;;  %v1118_v49 = vmul.f32 %v1090_v59, %v1020_v61 }
 0x304   :  { %v1101_v51 = vcombine.low %v1097_v58, %v1098_v52  ;;  %v1324_v52 = vld [vmem:[%s4254_s9] sm:$0x1] }
 0x306   :  { %v1108_v55 = vrot.slane %v1101_v51, %v4066_v17  ;;  %v1328_v51 = vld [vmem:[%s4255_s10] sm:$0x1] }
 0x308   :  { %v1115_v57 = vrot.slane %v1108_v55, %v4066_v17 }
 0x30a   :  { %v1117_v60 = vsub.f32 %v1085_v56, %v1115_v57 }
 0x30c   :  { %v1128_v62 = vrot.slane %v1117_v60, %v4076_v28  ;;  %v1124_v63 = vrot.slane %v1117_v60, %v4073_v26 }
 0x30e   :  { %v1132_v2 = vadd.f32 %v1128_v62, %v1119_v53  ;;  %v1131_v3 = vadd.f32 %v1124_v63, %v1118_v49 }
 0x310   :  { %v1134_v4 = vmul.f32 0.01, %v1132_v2  ;;  %v1133_v5 = vmul.f32 0.01, %v1131_v3 }
 0x312   :  { %v1136_v1 = vmax.f32 %v1132_v2, %v1134_v4  ;;  %v1135_v61 = vmax.f32 %v1131_v3, %v1133_v5  ;;  %v3435_v4 = vld [vmem:[%s4258_s13] sm:$0xff]  }
 0x314   :  { %v1138_v6 = vpack.c.bf16 %v1136_v1, %v1136_v1  ;;  %v1137_v7 = vpack.c.bf16 %v1135_v61, %v1135_v61  ;;  %v3436_v1 = vld [vmem:[%s4258_s13 + $0x8] sm:$0xff]   ;;  %v3437_v61 = vld [vmem:[%s4258_s13 + $0x10] sm:$0xff]  }
 0x316   :  { %1299 = vmatprep.mubr.bf16.mxu1 %v1138_v6  ;;  %v3438_v6 = vld [vmem:[%s4258_s13 + $0x18] sm:$0xff]  }
 0x317   :  { %1300 = vmatmul.mubr.bf16.vlgmr.msra.gmra.mrb[4].mxu1 %v1137_v7  ;;  %v3439_v7 = vld [vmem:[%s4258_s13 + $0x20] sm:$0xff]  }
 0x318   :  { %1488 = vmatprep.mubr.bf16.mxu1 %v3802_v0  ;;  %1457 = vmatpush1.bf16.msra.mxu1 %v3411_v9  ;;  %v3441_v9 = vld [vmem:[%s4258_s13 + $0x30] sm:$0xff]  }
 0x319   :  { %1458 = vmatprep.subr.bf16.mxu1 %v3416_v10  ;;  %v3442_v10 = vld [vmem:[%s4258_s13 + $0x38] sm:$0xff]  }
 0x31c   :  { %1459 = vmatpush1.bf16.msra.mxu1 %v3414_v11  ;;  %v1364_v11 = vld [vmem:[%s4257_s12] sm:$0x3] }
 0x31d   :  { %1460 = vmatprep.subr.bf16.mxu1 %v3419_v12  ;;  %v1369_v12 = vrot.slane %v1364_v11, %v4073_v26 }
 0x320   :  { %1461 = vmatpush1.bf16.msra.mxu1 %v3417_v13  ;;  %v1373_v13 = vrot.slane %v1364_v11, %v4076_v28 }
 0x321   :  { %1462 = vmatprep.subr.bf16.mxu1 %v3422_v14 }
 0x324   :  { %1463 = vmatpush1.bf16.msra.mxu1 %v3420_v15 }
 0x325   :  { %1464 = vmatprep.subr.bf16.mxu1 %v3425_v16 }
 0x328   :  { %1465 = vmatpush1.bf16.msra.mxu1 %v3423_v18 }
 0x329   :  { %1466 = vmatprep.subr.bf16.mxu1 %v3428_v19 }
 0x32c   :  { %1467 = vmatpush1.bf16.msra.mxu1 %v3426_v20 }
 0x32d   :  { %1468 = vmatprep.subr.bf16.mxu1 %v3431_v21 }
 0x330   :  { %1469 = vmatpush1.bf16.msra.mxu1 %v3429_v22 }
 0x331   :  { %1470 = vmatprep.subr.bf16.mxu1 %v3434_v23  ;;  %v1497_v23 = vld [vmem:[%s4293_s8] sm:$0xff] }
 0x334   :  { %1471 = vmatpush1.bf16.msra.mxu1 %v3432_v24 }
 0x335   :  { %3234 = vmatprep.subr.bf16.mxu1 %v3804_v25 }
 0x3ea   :  { %v3175_v27 = vpop.f32.mrb[4].mxu1 }
 0x3eb   :  { %v3176_v31 = vpop.f32.mrb[5].mxu1 }
 0x3ec   :  { %v3177_v32 = vadd.f32 %v3176_v31, %v3175_v27  ;;  %v3178_v33 = vpop.f32.mrb[6].mxu1 }
 0x3ed   :  { %v3179_v34 = vpop.f32.mrb[7].mxu1  ;;  %v3443_v33 = vld [vmem:[#allocation9] ss:$8 sps:$4 sm:$0xff]  }
 0x3ee   :  { %v1307_v35 = vrot.slane %v3177_v32, 4  ;;  %v1314_v36 = vmul.f32 %v3177_v32, %v3177_v32  ;;  %v3448_v34 = vld [vmem:[#allocation9 + $0x14] ss:$8 sps:$4 sm:$0xff]  }
 0x3f0   :  { %v1308_v37 = vadd.f32 %v3177_v32, %v1307_v35  ;;  %v1315_v38 = vrot.slane %v1314_v36, 4  ;;  %v3446_v35 = vld [vmem:[#allocation9 + $0x10] ss:$8 sps:$4 sm:$0xff]  }
 0x3f2   :  { %v1309_v39 = vrot.slane %v1308_v37, 2  ;;  %v1316_v40 = vadd.f32 %v1315_v38, %v1314_v36  ;;  %v3451_v36 = vld [vmem:[#allocation9 + $0x24] ss:$8 sps:$4 sm:$0xff]   ;;  %v3454_v38 = vld [vmem:[#allocation9 + $0x34] ss:$8 sps:$4 sm:$0xff]  }
 0x3f4   :  { %v1310_v41 = vadd.f32 %v1309_v39, %v1308_v37  ;;  %v1317_v42 = vrot.slane %v1316_v40, 2  ;;  %v3449_v37 = vld [vmem:[#allocation9 + $0x20] ss:$8 sps:$4 sm:$0xff]   ;;  %v3452_v39 = vld [vmem:[#allocation9 + $0x30] ss:$8 sps:$4 sm:$0xff]  }
 0x3f6   :  { %v1311_v43 = vrot.slane %v1310_v41, 1  ;;  %v1318_v44 = vadd.f32 %v1317_v42, %v1316_v40  ;;  %v3457_v40 = vld [vmem:[#allocation9 + $0x44] ss:$8 sps:$4 sm:$0xff]   ;;  %v3458_v42 = vld [vmem:[#allocation9 + $0x50] ss:$8 sps:$4 sm:$0xff]  }
 0x3f8   :  { %v1312_v46 = vadd.f32 %v1311_v43, %v1310_v41  ;;  %v1319_v48 = vrot.slane %v1318_v44, 1  ;;  %v3455_v41 = vld [vmem:[#allocation9 + $0x40] ss:$8 sps:$4 sm:$0xff]   ;;  %v3463_v43 = vld [vmem:[#allocation9 + $0x64] ss:$8 sps:$4 sm:$0xff]  }
 0x3fa   :  { %v1313_v50 = vmul.f32 0.125, %v1312_v46  ;;  %v1320_v54 = vadd.f32 %v1319_v48, %v1318_v44  ;;  %v3461_v44 = vld [vmem:[#allocation9 + $0x60] ss:$8 sps:$4 sm:$0xff]   ;;  %v3464_v46 = vld [vmem:[#allocation9 + $0x70] ss:$8 sps:$4 sm:$0xff]  }
 0x3fb   :  { %v3466_v48 = vld [vmem:[#allocation9 + $0x74] ss:$8 sps:$4 sm:$0xff]  }
 0x3fc   :  { %v1321_v47 = vmul.f32 0.125, %v1320_v54  ;;  %v1322_v59 = vmul.f32 %v1313_v50, %v1313_v50 }
 0x3fe   :  { %v1323_v45 = vsub.f32 %v1321_v47, %v1322_v59 }
 0x400   :  { %v1325_v58 = vadd.f32 1e-05, %v1323_v45 }
 0x402   :  { %3607 = vrsqrt.f32 %v1325_v58 }
 0x40c   :  { %v3608_v53 = vpop.eup %3607 }
 0x40d   :  { %v1327_v49 = vmul.f32 %v3608_v53, %v1324_v52 }
 0x40f   :  { %v1329_v55 = vmul.f32 %v1327_v49, %v1313_v50  ;;  %v1335_v56 = vrot.slane %v1327_v49, %v4073_v26 }
 0x411   :  { %v1330_v57 = vsub.f32 %v1328_v51, %v1329_v55  ;;  %v1337_v60 = vmul.f32 %v3177_v32, %v1335_v56  ;;  %v3445_v32 = vld [vmem:[#allocation9 + $0x4] ss:$8 sps:$4 sm:$0xff]  }
 0x413   :  { %v1342_v62 = vrot.slane %v1330_v57, %v4073_v26 }
 0x415   :  { %v1344_v63 = vadd.f32 %v1342_v62, %v1337_v60 }
 0x417   :  { %v1345_v2 = vmul.f32 0.01, %v1344_v63 }
 0x419   :  { %v1346_v3 = vmax.f32 %v1344_v63, %v1345_v2 }
 0x41b   :  { %v1347_v5 = vpack.c.bf16 %v1346_v3, %v1346_v3 }
 0x41d   :  { %1489 = vmatmul.mubr.bf16.vlgmr.msra.gmra.mrb[8].mxu1 %v1347_v5 }
 0x41e   :  { %3235 = vmatpush3.bf16.msra.mxu1 %v3435_v4  ;;  %3250 = vmatprep.mubr.msk.bf16.mxu1 %vm3805_vm1, %v3804_v25 }
 0x41f   :  { %3236 = vmatprep.subr.bf16.mxu1 %v3804_v25 }
 0x422   :  { %3237 = vmatpush3.bf16.msra.mxu1 %v3436_v1 }
 0x423   :  { %3238 = vmatprep.subr.bf16.mxu1 %v3804_v25 }
 0x426   :  { %3239 = vmatpush3.bf16.msra.mxu1 %v3437_v61 }
 0x427   :  { %3240 = vmatprep.subr.bf16.mxu1 %v3804_v25 }
 0x42a   :  { %3241 = vmatpush3.bf16.msra.mxu1 %v3438_v6  ;;  %v1625_v6 = vld [vmem:[%s4259_s14] sm:$0x1] }
 0x42b   :  { %3242 = vmatprep.subr.bf16.mxu1 %v3804_v25 }
 0x42e   :  { %3243 = vmatpush3.bf16.msra.mxu1 %v3439_v7 }
 0x42f   :  { %3244 = vmatprep.subr.bf16.mxu1 %v3804_v25 }
 0x432   :  { %3245 = vmatpush3.bf16.msra.mxu1 %v3440_v8 }
 0x433   :  { %3246 = vmatprep.subr.bf16.mxu1 %v3804_v25 }
 0x436   :  { %3247 = vmatpush3.bf16.msra.mxu1 %v3441_v9  ;;  %v1629_v9 = vld [vmem:[%s4260_s15] sm:$0x1] }
 0x437   :  { %3248 = vmatprep.subr.bf16.mxu1 %v3804_v25 }
 0x43a   :  { %3249 = vmatpush3.bf16.msra.mxu1 %v3442_v10 }
 0x43b   :  { %1745 = vmatprep.subr.bf16.mxu1 %v3445_v32  ;;  %v3481_v32 = vld [vmem:[#allocation10 + $0x44] ss:$16 sps:$4 sm:$0xff]  }
 0x4f0   :  { %v1490_v14 = vpop.f32.mrb[8].mxu1 }
 0x4f1   :  { %v1491_v15 = vadd.f32 %v1490_v14, %v1369_v12  ;;  %v1492_v16 = vpop.f32.mrb[9].mxu1 }
 0x4f2   :  { %v1493_v18 = vadd.f32 %v1492_v16, %v1373_v13  ;;  %v1494_v19 = vpop.f32.mrb[10].mxu1 }
 0x4f3   :  { %2912 = vst [vmem:[%s4269_s24] sm:$0xff] %v1491_v15  ;;  %v1495_v20 = vpop.f32.mrb[11].mxu1 }
 0x4f4   :  { %v1498_v21 = vmul.f32 0.5, %v1493_v18  ;;  %2913 = vst [vmem:[%s4269_s24 + $0x8] sm:$0xff] %v1493_v18  ;;  %v3469_v20 = vld [vmem:[#allocation10 + $0x4] ss:$16 sps:$4 sm:$0xff]  }
 0x4f5   :  { %2282 = vmatprep.subr.bf16.mxu0 %v3469_v20  ;;  %v3554_v20 = vld [vmem:[#allocation10 + $0x1c8] ss:$16 sps:$4 sm:$0xff]  }
 0x4f6   :  { %v1499_v22 = vmul.f32 1.442695, %v1498_v21  ;;  %v3472_v21 = vld [vmem:[#allocation10 + $0xc] ss:$16 sps:$4 sm:$0xff]  }
 0x4f8   :  { %3609 = vpow2.f32 %v1499_v22  ;;  %v3467_v22 = vld [vmem:[#allocation10] ss:$16 sps:$4 sm:$0xff]  }
 0x4f9   :  { %2283 = vmatpush1.bf16.msra.mxu0 %v3467_v22  ;;  %v3562_v22 = vld [vmem:[#allocation10 + $0x1ec] ss:$16 sps:$4 sm:$0xff]  }
 0x502   :  { %v3610_v24 = vpop.eup %3609 }
 0x503   :  { %v1501_v25 = vmul.f32 %v3610_v24, %v1497_v23  ;;  %v3470_v23 = vld [vmem:[#allocation10 + $0x8] ss:$16 sps:$4 sm:$0xff]   ;;  %v3475_v24 = vld [vmem:[#allocation10 + $0x24] ss:$16 sps:$4 sm:$0xff]  }
 0x504   :  { %2284 = vmatprep.subr.bf16.mxu0 %v3475_v24  ;;  %v3560_v24 = vld [vmem:[#allocation10 + $0x1e8] ss:$16 sps:$4 sm:$0xff]  }
 0x505   :  { %v1502_v27 = vadd.f32 %v1501_v25, %v1491_v15  ;;  %v3478_v25 = vld [vmem:[#allocation10 + $0x2c] ss:$16 sps:$4 sm:$0xff]  }
 0x507   :  { %v1503_v31 = vpack.c.bf16 %v1502_v27, %v1502_v27  ;;  %2914 = vst [vmem:[%s4269_s24 + $0x10] sm:$0xff] %v1502_v27  ;;  %v3473_v27 = vld [vmem:[#allocation10 + $0x20] ss:$16 sps:$4 sm:$0xff]  }
 0x508   :  { %2285 = vmatpush1.bf16.msra.mxu0 %v3473_v27 }
 0x509   :  { %3251 = vmatmul.mubr.bf16.vlgmr.msra.gmra.mrb[12].mxu1 %v1503_v31  ;;  %v3476_v31 = vld [vmem:[#allocation10 + $0x28] ss:$16 sps:$4 sm:$0xff]   ;;  %2286 = vmatprep.subr.bf16.mxu0 %v3481_v32 }
 0x50a   :  { %1777 = vmatprep.mubr.bf16.mxu1 %v3802_v0  ;;  %1746 = vmatpush1.bf16.msra.mxu1 %v3443_v33  ;;  %v3460_v0 = vld [vmem:[#allocation9 + $0x54] ss:$8 sps:$4 sm:$0xff]  }
 0x50b   :  { %1747 = vmatprep.subr.bf16.mxu1 %v3448_v34  ;;  %v3484_v33 = vld [vmem:[#allocation10 + $0x4c] ss:$16 sps:$4 sm:$0xff]   ;;  %v3479_v34 = vld [vmem:[#allocation10 + $0x40] ss:$16 sps:$4 sm:$0xff]  }
 0x50c   :  { %2287 = vmatpush1.bf16.msra.mxu0 %v3479_v34 }
 0x50e   :  { %1748 = vmatpush1.bf16.msra.mxu1 %v3446_v35  ;;  %v3482_v35 = vld [vmem:[#allocation10 + $0x48] ss:$16 sps:$4 sm:$0xff]  }
 0x50f   :  { %1749 = vmatprep.subr.bf16.mxu1 %v3451_v36  ;;  %v3487_v36 = vld [vmem:[#allocation10 + $0x64] ss:$16 sps:$4 sm:$0xff]  }
 0x510   :  { %2288 = vmatprep.subr.bf16.mxu0 %v3487_v36 }
 0x512   :  { %1750 = vmatpush1.bf16.msra.mxu1 %v3449_v37  ;;  %v3490_v37 = vld [vmem:[#allocation10 + $0x6c] ss:$16 sps:$4 sm:$0xff]  }
 0x513   :  { %1751 = vmatprep.subr.bf16.mxu1 %v3454_v38  ;;  %v3485_v38 = vld [vmem:[#allocation10 + $0x60] ss:$16 sps:$4 sm:$0xff]  }
 0x514   :  { %2289 = vmatpush1.bf16.msra.mxu0 %v3485_v38 }
 0x516   :  { %1752 = vmatpush1.bf16.msra.mxu1 %v3452_v39  ;;  %v3488_v39 = vld [vmem:[#allocation10 + $0x68] ss:$16 sps:$4 sm:$0xff]  }
 0x517   :  { %1753 = vmatprep.subr.bf16.mxu1 %v3457_v40  ;;  %v3493_v40 = vld [vmem:[#allocation10 + $0x84] ss:$16 sps:$4 sm:$0xff]  }
 0x518   :  { %2290 = vmatprep.subr.bf16.mxu0 %v3493_v40 }
 0x51a   :  { %1754 = vmatpush1.bf16.msra.mxu1 %v3455_v41  ;;  %v3496_v41 = vld [vmem:[#allocation10 + $0x8c] ss:$16 sps:$4 sm:$0xff]  }
 0x51b   :  { %1755 = vmatprep.subr.bf16.mxu1 %v3460_v0  ;;  %v3491_v0 = vld [vmem:[#allocation10 + $0x80] ss:$16 sps:$4 sm:$0xff]  }
 0x51c   :  { %2291 = vmatpush1.bf16.msra.mxu0 %v3491_v0 }
 0x51e   :  { %1756 = vmatpush1.bf16.msra.mxu1 %v3458_v42  ;;  %v3494_v42 = vld [vmem:[#allocation10 + $0x88] ss:$16 sps:$4 sm:$0xff]  }
 0x51f   :  { %1757 = vmatprep.subr.bf16.mxu1 %v3463_v43  ;;  %v3499_v43 = vld [vmem:[#allocation10 + $0xa4] ss:$16 sps:$4 sm:$0xff]  }
 0x520   :  { %2292 = vmatprep.subr.bf16.mxu0 %v3499_v43 }
 0x522   :  { %1758 = vmatpush1.bf16.msra.mxu1 %v3461_v44  ;;  %v3502_v44 = vld [vmem:[#allocation10 + $0xac] ss:$16 sps:$4 sm:$0xff]  }
 0x523   :  { %1759 = vmatprep.subr.bf16.mxu1 %v3466_v48  ;;  %v3500_v48 = vld [vmem:[#allocation10 + $0xa8] ss:$16 sps:$4 sm:$0xff]  }
 0x526   :  { %1760 = vmatpush1.bf16.msra.mxu1 %v3464_v46  ;;  %v3497_v46 = vld [vmem:[#allocation10 + $0xa0] ss:$16 sps:$4 sm:$0xff]  }
 0x527   :  { %2323 = vmatprep.subr.bf16.mxu1 %v3472_v21  ;;  %2293 = vmatpush1.bf16.msra.mxu0 %v3497_v46  ;;  %v3559_v21 = vld [vmem:[#allocation10 + $0x1e4] ss:$16 sps:$4 sm:$0xff]  }
 0x5dc   :  { %v1602_v50 = vpop.f32.mrb[12].mxu1 }
 0x5dd   :  { %v1608_v54 = vrot.slane %v1602_v50, 4  ;;  %v1615_v47 = vmul.f32 %v1602_v50, %v1602_v50  ;;  %v3252_v59 = vpop.f32.mrb[13].mxu1 }
 0x5de   :  { %v1605_v45 = vpop.f32.mrb[14].mxu1  ;;  %v3506_v59 = vld [vmem:[#allocation10 + $0xc8] ss:$16 sps:$4 sm:$0xff]  }
 0x5df   :  { %v1609_v58 = vadd.f32 %v1608_v54, %v1602_v50  ;;  %v1616_v52 = vrot.slane %v1615_v47, 4  ;;  %v3253_v53 = vpop.f32.mrb[15].mxu1  ;;  %v3508_v54 = vld [vmem:[#allocation10 + $0xcc] ss:$16 sps:$4 sm:$0xff]   ;;  %v3511_v45 = vld [vmem:[#allocation10 + $0xe4] ss:$16 sps:$4 sm:$0xff]  }
 0x5e0   :  { %v3512_v53 = vld [vmem:[#allocation10 + $0xe8] ss:$16 sps:$4 sm:$0xff]  }
 0x5e1   :  { %v1610_v49 = vrot.slane %v1609_v58, 2  ;;  %v1617_v51 = vadd.f32 %v1616_v52, %v1615_v47  ;;  %v3503_v47 = vld [vmem:[#allocation10 + $0xc0] ss:$16 sps:$4 sm:$0xff]  }
 0x5e2   :  { %v3509_v52 = vld [vmem:[#allocation10 + $0xe0] ss:$16 sps:$4 sm:$0xff]  }
 0x5e3   :  { %v1611_v55 = vadd.f32 %v1610_v49, %v1609_v58  ;;  %v1618_v56 = vrot.slane %v1617_v51, 2  ;;  %v3514_v58 = vld [vmem:[#allocation10 + $0xec] ss:$16 sps:$4 sm:$0xff]   ;;  %v3517_v49 = vld [vmem:[#allocation10 + $0x104] ss:$16 sps:$4 sm:$0xff]  }
 0x5e5   :  { %v1612_v57 = vrot.slane %v1611_v55, 1  ;;  %v1619_v60 = vadd.f32 %v1618_v56, %v1617_v51  ;;  %v3520_v51 = vld [vmem:[#allocation10 + $0x10c] ss:$16 sps:$4 sm:$0xff]   ;;  %v3518_v56 = vld [vmem:[#allocation10 + $0x108] ss:$16 sps:$4 sm:$0xff]  }
 0x5e7   :  { %v1613_v62 = vadd.f32 %v1612_v57, %v1611_v55  ;;  %v1620_v63 = vrot.slane %v1619_v60, 1  ;;  %v3515_v55 = vld [vmem:[#allocation10 + $0x100] ss:$16 sps:$4 sm:$0xff]   ;;  %v3523_v57 = vld [vmem:[#allocation10 + $0x124] ss:$16 sps:$4 sm:$0xff]  }
 0x5e9   :  { %v1614_v2 = vmul.f32 0.125, %v1613_v62  ;;  %v1621_v3 = vadd.f32 %v1620_v63, %v1619_v60  ;;  %v3526_v60 = vld [vmem:[#allocation10 + $0x12c] ss:$16 sps:$4 sm:$0xff]   ;;  %v3521_v62 = vld [vmem:[#allocation10 + $0x120] ss:$16 sps:$4 sm:$0xff]  }
 0x5ea   :  { %v3524_v63 = vld [vmem:[#allocation10 + $0x128] ss:$16 sps:$4 sm:$0xff]  }
 0x5eb   :  { %v1622_v4 = vmul.f32 0.125, %v1621_v3  ;;  %v1623_v5 = vmul.f32 %v1614_v2, %v1614_v2  ;;  %v3532_v3 = vld [vmem:[#allocation10 + $0x14c] ss:$16 sps:$4 sm:$0xff]  }
 0x5ed   :  { %v1624_v1 = vsub.f32 %v1622_v4, %v1623_v5  ;;  %v3527_v4 = vld [vmem:[#allocation10 + $0x140] ss:$16 sps:$4 sm:$0xff]   ;;  %v3530_v5 = vld [vmem:[#allocation10 + $0x148] ss:$16 sps:$4 sm:$0xff]  }
 0x5ef   :  { %v1626_v61 = vadd.f32 1e-05, %v1624_v1  ;;  %v3535_v1 = vld [vmem:[#allocation10 + $0x164] ss:$16 sps:$4 sm:$0xff]  }
 0x5f1   :  { %3611 = vrsqrt.f32 %v1626_v61  ;;  %v3538_v61 = vld [vmem:[#allocation10 + $0x16c] ss:$16 sps:$4 sm:$0xff]  }
 0x5fb   :  { %v3612_v7 = vpop.eup %3611 }
 0x5fc   :  { %v1628_v8 = vmul.f32 %v3612_v7, %v1625_v6  ;;  %v3533_v6 = vld [vmem:[#allocation10 + $0x160] ss:$16 sps:$4 sm:$0xff]   ;;  %v3536_v7 = vld [vmem:[#allocation10 + $0x168] ss:$16 sps:$4 sm:$0xff]  }
 0x5fe   :  { %v1630_v10 = vmul.f32 %v1628_v8, %v1614_v2  ;;  %v1636_v11 = vrot.slane %v1628_v8, %v4073_v26  ;;  %v3529_v2 = vld [vmem:[#allocation10 + $0x144] ss:$16 sps:$4 sm:$0xff]  }
 0x5ff   :  { %v3541_v8 = vld [vmem:[#allocation10 + $0x184] ss:$16 sps:$4 sm:$0xff]  }
 0x600   :  { %v1631_v12 = vsub.f32 %v1629_v9, %v1630_v10  ;;  %v1638_v13 = vmul.f32 %v1636_v11, %v1602_v50  ;;  %v3505_v50 = vld [vmem:[#allocation10 + $0xc4] ss:$16 sps:$4 sm:$0xff]   ;;  %v3544_v9 = vld [vmem:[#allocation10 + $0x18c] ss:$16 sps:$4 sm:$0xff]   ;;  %v3539_v10 = vld [vmem:[#allocation10 + $0x180] ss:$16 sps:$4 sm:$0xff]  }
 0x601   :  { %2294 = vmatprep.subr.bf16.mxu0 %v3505_v50  ;;  %v3542_v11 = vld [vmem:[#allocation10 + $0x188] ss:$16 sps:$4 sm:$0xff]  }
 0x602   :  { %v1643_v14 = vrot.slane %v1631_v12, %v4073_v26  ;;  %2295 = vmatpush1.bf16.msra.mxu0 %v3503_v47  ;;  %v3547_v12 = vld [vmem:[#allocation10 + $0x1a4] ss:$16 sps:$4 sm:$0xff]  }
 0x603   :  { %2296 = vmatprep.subr.bf16.mxu0 %v3511_v45 }
 0x604   :  { %v1645_v15 = vadd.f32 %v1643_v14, %v1638_v13  ;;  %v3550_v13 = vld [vmem:[#allocation10 + $0x1ac] ss:$16 sps:$4 sm:$0xff]   ;;  %v3545_v14 = vld [vmem:[#allocation10 + $0x1a0] ss:$16 sps:$4 sm:$0xff]  }
 0x606   :  { %v1646_v16 = vmul.f32 0.01, %v1645_v15  ;;  %2297 = vmatpush1.bf16.msra.mxu0 %v3509_v52 }
 0x607   :  { %2298 = vmatprep.subr.bf16.mxu0 %v3517_v49 }
 0x608   :  { %v1647_v18 = vmax.f32 %v1645_v15, %v1646_v16  ;;  %v3548_v15 = vld [vmem:[#allocation10 + $0x1a8] ss:$16 sps:$4 sm:$0xff]   ;;  %v3553_v16 = vld [vmem:[#allocation10 + $0x1c4] ss:$16 sps:$4 sm:$0xff]  }
 0x60a   :  { %v1648_v19 = vpack.c.bf16 %v1647_v18, %v1647_v18  ;;  %2299 = vmatpush1.bf16.msra.mxu0 %v3515_v55  ;;  %v3556_v18 = vld [vmem:[#allocation10 + $0x1cc] ss:$16 sps:$4 sm:$0xff]  }
 0x60b   :  { %2300 = vmatprep.subr.bf16.mxu0 %v3523_v57 }
 0x60c   :  { %1778 = vmatmul.mubr.bf16.vlgmr.msra.gmra.mrb[16].mxu1 %v1648_v19  ;;  %v3551_v19 = vld [vmem:[#allocation10 + $0x1c0] ss:$16 sps:$4 sm:$0xff]  }
 0x60d   :  { %2324 = vmatpush1.bf16.msra.mxu1 %v3470_v23  ;;  %v3557_v23 = vld [vmem:[#allocation10 + $0x1e0] ss:$16 sps:$4 sm:$0xff]  }
 0x60e   :  { %2325 = vmatprep.subr.bf16.mxu1 %v3478_v25  ;;  %2301 = vmatpush1.bf16.msra.mxu0 %v3521_v62 }
 0x60f   :  { %2302 = vmatprep.subr.bf16.mxu0 %v3529_v2 }
 0x611   :  { %2326 = vmatpush1.bf16.msra.mxu1 %v3476_v31 }
 0x612   :  { %2327 = vmatprep.subr.bf16.mxu1 %v3484_v33  ;;  %2303 = vmatpush1.bf16.msra.mxu0 %v3527_v4 }
 0x613   :  { %2304 = vmatprep.subr.bf16.mxu0 %v3535_v1 }
 0x615   :  { %2328 = vmatpush1.bf16.msra.mxu1 %v3482_v35 }
 0x616   :  { %2329 = vmatprep.subr.bf16.mxu1 %v3490_v37  ;;  %2305 = vmatpush1.bf16.msra.mxu0 %v3533_v6 }
 0x617   :  { %2306 = vmatprep.subr.bf16.mxu0 %v3541_v8 }
 0x619   :  { %2330 = vmatpush1.bf16.msra.mxu1 %v3488_v39 }
 0x61a   :  { %2331 = vmatprep.subr.bf16.mxu1 %v3496_v41  ;;  %2307 = vmatpush1.bf16.msra.mxu0 %v3539_v10 }
 0x61b   :  { %2308 = vmatprep.subr.bf16.mxu0 %v3547_v12 }
 0x61d   :  { %2332 = vmatpush1.bf16.msra.mxu1 %v3494_v42 }
 0x61e   :  { %2333 = vmatprep.subr.bf16.mxu1 %v3502_v44  ;;  %2309 = vmatpush1.bf16.msra.mxu0 %v3545_v14 }
 0x61f   :  { %2310 = vmatprep.subr.bf16.mxu0 %v3553_v16 }
 0x621   :  { %2334 = vmatpush1.bf16.msra.mxu1 %v3500_v48 }
 0x622   :  { %2335 = vmatprep.subr.bf16.mxu1 %v3508_v54  ;;  %2311 = vmatpush1.bf16.msra.mxu0 %v3551_v19 }
 0x623   :  { %2312 = vmatprep.subr.bf16.mxu0 %v3559_v21  ;;  %v1844_v21 = vld [vmem:[%s4263_s18] sm:$0x3] }
 0x625   :  { %2336 = vmatpush1.bf16.msra.mxu1 %v3506_v59 }
 0x626   :  { %2337 = vmatprep.subr.bf16.mxu1 %v3514_v58  ;;  %2313 = vmatpush1.bf16.msra.mxu0 %v3557_v23 }
 0x629   :  { %2338 = vmatpush1.bf16.msra.mxu1 %v3512_v53 }
 0x62a   :  { %2339 = vmatprep.subr.bf16.mxu1 %v3520_v51 }
 0x62d   :  { %2340 = vmatpush1.bf16.msra.mxu1 %v3518_v56 }
 0x62e   :  { %2341 = vmatprep.subr.bf16.mxu1 %v3526_v60 }
 0x631   :  { %2342 = vmatpush1.bf16.msra.mxu1 %v3524_v63 }
 0x632   :  { %2343 = vmatprep.subr.bf16.mxu1 %v3532_v3 }
 0x635   :  { %2344 = vmatpush1.bf16.msra.mxu1 %v3530_v5 }
 0x636   :  { %2345 = vmatprep.subr.bf16.mxu1 %v3538_v61 }
 0x639   :  { %2346 = vmatpush1.bf16.msra.mxu1 %v3536_v7 }
 0x63a   :  { %2347 = vmatprep.subr.bf16.mxu1 %v3544_v9  ;;  %v1820_v9 = vld [vmem:[%s4262_s17] sm:$0x3] }
 0x63d   :  { %2348 = vmatpush1.bf16.msra.mxu1 %v3542_v11 }
 0x63e   :  { %2349 = vmatprep.subr.bf16.mxu1 %v3550_v13 }
 0x641   :  { %2350 = vmatpush1.bf16.msra.mxu1 %v3548_v15 }
 0x642   :  { %2351 = vmatprep.subr.bf16.mxu1 %v3556_v18 }
 0x645   :  { %2352 = vmatpush1.bf16.msra.mxu1 %v3554_v20 }
 0x646   :  { %2353 = vmatprep.subr.bf16.mxu1 %v3562_v22 }
 0x649   :  { %2354 = vmatpush1.bf16.msra.mxu1 %v3560_v24 }
 0x6df   :  { %v1779_v25 = vpop.f32.mrb[16].mxu1 }
 0x6e0   :  { %v1786_v27 = vrot.slane %v1779_v25, 4  ;;  %v1800_v31 = vmul.f32 %v1779_v25, %v1779_v25  ;;  %v1781_v32 = vpop.f32.mrb[17].mxu1 }
 0x6e1   :  { %v1792_v33 = vrot.slane %v1781_v32, 4  ;;  %v1801_v34 = vmul.f32 %v1781_v32, %v1781_v32  ;;  %v1783_v35 = vpop.f32.mrb[18].mxu1 }
 0x6e2   :  { %v1787_v36 = vadd.f32 %v1786_v27, %v1779_v25  ;;  %v1802_v37 = vrot.slane %v1800_v31, 4  ;;  %v1784_v38 = vpop.f32.mrb[19].mxu1 }
 0x6e3   :  { %v1793_v39 = vadd.f32 %v1792_v33, %v1781_v32  ;;  %v1808_v40 = vrot.slane %v1801_v34, 4  ;;  %v3563_v38 = vld [vmem:[#allocation12 + $0x40] sm:$0xff]  }
 0x6e4   :  { %v1788_v41 = vrot.slane %v1787_v36, 2  ;;  %v1803_v0 = vadd.f32 %v1802_v37, %v1800_v31  ;;  %3190 = vmatprep.subr.bf16.mxu0 %v3563_v38 }
 0x6e5   :  { %v1794_v42 = vrot.slane %v1793_v39, 2  ;;  %v1809_v43 = vadd.f32 %v1808_v40, %v1801_v34  ;;  %v3565_v40 = vld [vmem:[#allocation12] sm:$0xff]  }
 0x6e6   :  { %v1789_v44 = vadd.f32 %v1788_v41, %v1787_v36  ;;  %v1804_v46 = vrot.slane %v1803_v0, 2  ;;  %v3566_v41 = vld [vmem:[#allocation12 + $0x80] sm:$0xff]  }
 0x6e7   :  { %v1795_v48 = vadd.f32 %v1794_v42, %v1793_v39  ;;  %v1810_v50 = vrot.slane %v1809_v43, 2  ;;  %v3564_v39 = vld [vmem:[#allocation12 + $0xc0] sm:$0xff]   ;;  %v3568_v42 = vld [vmem:[#allocation12 + $0xc8] sm:$0xff]  }
 0x6e8   :  { %v1790_v54 = vrot.slane %v1789_v44, 1  ;;  %v1805_v47 = vadd.f32 %v1804_v46, %v1803_v0  ;;  %3212 = vmatprep.subr.bf16.mxu1 %v3564_v39  ;;  %v3567_v0 = vld [vmem:[#allocation12 + $0x48] sm:$0xff]   ;;  %v3571_v46 = vld [vmem:[#allocation12 + $0x50] sm:$0xff]  }
 0x6e9   :  { %v1796_v59 = vrot.slane %v1795_v48, 1  ;;  %v1811_v45 = vadd.f32 %v1810_v50, %v1809_v43  ;;  %v3569_v43 = vld [vmem:[#allocation12 + $0x8] sm:$0xff]   ;;  %v3573_v50 = vld [vmem:[#allocation12 + $0x10] sm:$0xff]  }
 0x6ea   :  { %v1791_v58 = vadd.f32 %v1790_v54, %v1789_v44  ;;  %v1806_v52 = vrot.slane %v1805_v47, 1  ;;  %v3570_v44 = vld [vmem:[#allocation12 + $0x88] sm:$0xff]   ;;  %v3574_v54 = vld [vmem:[#allocation12 + $0x90] sm:$0xff]  }
 0x6eb   :  { %v1797_v53 = vadd.f32 %v1796_v59, %v1795_v48  ;;  %v1812_v49 = vrot.slane %v1811_v45, 1  ;;  %v3572_v48 = vld [vmem:[#allocation12 + $0xd0] sm:$0xff]   ;;  %v3576_v59 = vld [vmem:[#allocation12 + $0xd8] sm:$0xff]  }
 0x6ec   :  { %v1798_v51 = vmul.f32 0.125, %v1791_v58  ;;  %v1807_v55 = vadd.f32 %v1806_v52, %v1805_v47  ;;  %v3575_v47 = vld [vmem:[#allocation12 + $0x58] sm:$0xff]   ;;  %v3579_v52 = vld [vmem:[#allocation12 + $0x60] sm:$0xff]  }
 0x6ed   :  { %v1799_v56 = vmul.f32 0.125, %v1797_v53  ;;  %v1813_v57 = vadd.f32 %v1812_v49, %v1811_v45  ;;  %v3577_v45 = vld [vmem:[#allocation12 + $0x18] sm:$0xff]   ;;  %v3580_v53 = vld [vmem:[#allocation12 + $0xe0] sm:$0xff]  }
 0x6ee   :  { %v1814_v60 = vmul.f32 0.125, %v1807_v55  ;;  %v1816_v62 = vmul.f32 %v1798_v51, %v1798_v51  ;;  %v3578_v58 = vld [vmem:[#allocation12 + $0x98] sm:$0xff]   ;;  %v3581_v49 = vld [vmem:[#allocation12 + $0x20] sm:$0xff]   ;;  %v3583_v55 = vld [vmem:[#allocation12 + $0x68] sm:$0xff]  }
 0x6ef   :  { %v1815_v63 = vmul.f32 0.125, %v1813_v57  ;;  %v1817_v2 = vmul.f32 %v1799_v56, %v1799_v56  ;;  %v3585_v57 = vld [vmem:[#allocation12 + $0x28] sm:$0xff]  }
 0x6f0   :  { %v1818_v3 = vsub.f32 %v1814_v60, %v1816_v62  ;;  %v3586_v60 = vld [vmem:[#allocation12 + $0xa8] sm:$0xff]   ;;  %v3587_v62 = vld [vmem:[#allocation12 + $0x70] sm:$0xff]  }
 0x6f1   :  { %v1819_v4 = vsub.f32 %v1815_v63, %v1817_v2  ;;  %v3588_v63 = vld [vmem:[#allocation12 + $0xf0] sm:$0xff]  }
 0x6f2   :  { %v1821_v5 = vadd.f32 1e-05, %v1818_v3  ;;  %v3589_v2 = vld [vmem:[#allocation12 + $0x30] sm:$0xff]  }
 0x6f3   :  { %v1822_v1 = vadd.f32 1e-05, %v1819_v4  ;;  %v3590_v3 = vld [vmem:[#allocation12 + $0xb0] sm:$0xff]   ;;  %v3591_v4 = vld [vmem:[#allocation12 + $0x78] sm:$0xff]  }
 0x6f4   :  { %3613 = vrsqrt.f32 %v1821_v5  ;;  %v3592_v5 = vld [vmem:[#allocation12 + $0xf8] sm:$0xff]  }
 0x6f5   :  { %3615 = vrsqrt.f32 %v1822_v1  ;;  %v3593_v1 = vld [vmem:[#allocation12 + $0x38] sm:$0xff]  }
 0x6fe   :  { %v3614_v61 = vpop.eup %3613 }
 0x6ff   :  { %v3616_v6 = vpop.eup %3615 }
 0x700   :  { %v1827_v7 = vcombine.low %v3614_v61, %v3616_v6  ;;  %v3594_v61 = vld [vmem:[#allocation12 + $0xb8] sm:$0xff]  }
 0x702   :  { %v1834_v8 = vrot.slane %v1827_v7, %v4066_v17 }
 0x704   :  { %v1841_v10 = vrot.slane %v1834_v8, %v4066_v17 }
 0x706   :  { %v1843_v11 = vmul.f32 %v1841_v10, %v1820_v9 }
 0x708   :  { %v1849_v12 = vrot.slane %v1843_v11, %v4073_v26  ;;  %v1853_v13 = vrot.slane %v1843_v11, %v4076_v28 }
 0x70a   :  { %v1856_v14 = vmul.f32 %v1849_v12, %v1798_v51  ;;  %v1857_v15 = vmul.f32 %v1853_v13, %v1799_v56  ;;  %v1878_v16 = vmul.f32 %v1853_v13, %v1781_v32  ;;  %v1877_v18 = vmul.f32 %v1849_v12, %v1779_v25  ;;  %v3582_v51 = vld [vmem:[#allocation12 + $0xa0] sm:$0xff]   ;;  %v3584_v56 = vld [vmem:[#allocation12 + $0xe8] sm:$0xff]  }
 0x70c   :  { %v1860_v19 = vcombine.low %v1856_v14, %v1857_v15 }
 0x70e   :  { %v1867_v20 = vrot.slane %v1860_v19, %v4066_v17 }
 0x710   :  { %v1874_v22 = vrot.slane %v1867_v20, %v4066_v17 }
 0x712   :  { %v1876_v23 = vsub.f32 %v1844_v21, %v1874_v22 }
 0x714   :  { %v1887_v24 = vrot.slane %v1876_v23, %v4076_v28  ;;  %v1883_v27 = vrot.slane %v1876_v23, %v4073_v26 }
 0x716   :  { %v1891_v31 = vadd.f32 %v1887_v24, %v1878_v16  ;;  %v1890_v33 = vadd.f32 %v1883_v27, %v1877_v18 }
 0x718   :  { %v1893_v34 = vmul.f32 0.01, %v1891_v31  ;;  %v1892_v35 = vmul.f32 0.01, %v1890_v33 }
 0x71a   :  { %v1895_v32 = vmax.f32 %v1891_v31, %v1893_v34  ;;  %v1894_v25 = vmax.f32 %v1890_v33, %v1892_v35 }
 0x71c   :  { %v1897_v36 = vpack.c.bf16 %v1895_v32, %v1895_v32  ;;  %v1896_v37 = vpack.c.bf16 %v1894_v25, %v1894_v25 }
 0x71e   :  { %2314 = vmatprep.mubr.bf16.mxu0 %v1897_v36  ;;  %2355 = vmatprep.mubr.bf16.mxu1 %v1897_v36 }
 0x71f   :  { %2315 = vmatmul.mubr.bf16.vlgmr.msra.gmra.mrb[8].mxu0 %v1896_v37  ;;  %2356 = vmatmul.mubr.bf16.vlgmr.msra.gmra.mrb[20].mxu1 %v1896_v37 }
 0x720   :  { %3191 = vmatpush3.bf16.msra.mxu0 %v3565_v40  ;;  %3213 = vmatpush3.bf16.msra.mxu1 %v3566_v41 }
 0x721   :  { %3192 = vmatprep.subr.bf16.mxu0 %v3567_v0  ;;  %3214 = vmatprep.subr.bf16.mxu1 %v3568_v42 }
 0x724   :  { %3193 = vmatpush3.bf16.msra.mxu0 %v3569_v43  ;;  %3215 = vmatpush3.bf16.msra.mxu1 %v3570_v44 }
 0x725   :  { %3194 = vmatprep.subr.bf16.mxu0 %v3571_v46  ;;  %3216 = vmatprep.subr.bf16.mxu1 %v3572_v48 }
 0x728   :  { %3195 = vmatpush3.bf16.msra.mxu0 %v3573_v50  ;;  %3217 = vmatpush3.bf16.msra.mxu1 %v3574_v54 }
 0x729   :  { %3196 = vmatprep.subr.bf16.mxu0 %v3575_v47  ;;  %3218 = vmatprep.subr.bf16.mxu1 %v3576_v59 }
 0x72c   :  { %3197 = vmatpush3.bf16.msra.mxu0 %v3577_v45  ;;  %3219 = vmatpush3.bf16.msra.mxu1 %v3578_v58 }
 0x72d   :  { %3198 = vmatprep.subr.bf16.mxu0 %v3579_v52  ;;  %3220 = vmatprep.subr.bf16.mxu1 %v3580_v53 }
 0x730   :  { %3199 = vmatpush3.bf16.msra.mxu0 %v3581_v49  ;;  %3221 = vmatpush3.bf16.msra.mxu1 %v3582_v51 }
 0x731   :  { %3200 = vmatprep.subr.bf16.mxu0 %v3583_v55  ;;  %3222 = vmatprep.subr.bf16.mxu1 %v3584_v56 }
 0x734   :  { %3201 = vmatpush3.bf16.msra.mxu0 %v3585_v57  ;;  %3223 = vmatpush3.bf16.msra.mxu1 %v3586_v60 }
 0x735   :  { %3202 = vmatprep.subr.bf16.mxu0 %v3587_v62  ;;  %3224 = vmatprep.subr.bf16.mxu1 %v3588_v63 }
 0x738   :  { %3203 = vmatpush3.bf16.msra.mxu0 %v3589_v2  ;;  %3225 = vmatpush3.bf16.msra.mxu1 %v3590_v3 }
 0x739   :  { %3204 = vmatprep.subr.bf16.mxu0 %v3591_v4  ;;  %3226 = vmatprep.subr.bf16.mxu1 %v3592_v5 }
 0x73c   :  { %3205 = vmatpush3.bf16.msra.mxu0 %v3593_v1  ;;  %3227 = vmatpush3.bf16.msra.mxu1 %v3594_v61 }
 0x7f2   :  { %v4191_v6 = vpop.f32.mrb[8].mxu0  ;;  %v4193_v7 = vpop.f32.mrb[20].mxu1 }
 0x7f3   :  { %v2364_v8 = vrot.slane %v4191_v6, 4  ;;  %v2392_v9 = vmul.f32 %v4191_v6, %v4191_v6  ;;  %v2376_v10 = vrot.slane %v4193_v7, 4  ;;  %v2394_v11 = vmul.f32 %v4193_v7, %v4193_v7  ;;  %v4201_v12 = vpop.f32.mrb[9].mxu0  ;;  %v4203_v13 = vpop.f32.mrb[21].mxu1 }
 0x7f4   :  { %v2370_v14 = vrot.slane %v4201_v12, 4  ;;  %v2393_v15 = vmul.f32 %v4201_v12, %v4201_v12  ;;  %v2382_v16 = vrot.slane %v4203_v13, 4  ;;  %v2395_v18 = vmul.f32 %v4203_v13, %v4203_v13  ;;  %v2320_v19 = vpop.f32.mrb[10].mxu0  ;;  %v2361_v20 = vpop.f32.mrb[22].mxu1 }
 0x7f5   :  { %v2365_v21 = vadd.f32 %v2364_v8, %v4191_v6  ;;  %v2396_v22 = vrot.slane %v2392_v9, 4  ;;  %v2377_v23 = vadd.f32 %v2376_v10, %v4193_v7  ;;  %v2408_v24 = vrot.slane %v2394_v11, 4  ;;  %v2321_v27 = vpop.f32.mrb[11].mxu0  ;;  %v2362_v31 = vpop.f32.mrb[23].mxu1 }
 0x7f6   :  { %v2371_v33 = vadd.f32 %v2370_v14, %v4201_v12  ;;  %v2402_v34 = vrot.slane %v2393_v15, 4  ;;  %v2383_v35 = vadd.f32 %v2382_v16, %v4203_v13  ;;  %v2414_v32 = vrot.slane %v2395_v18, 4 }
 0x7f7   :  { %v2366_v25 = vrot.slane %v2365_v21, 2  ;;  %v2397_v36 = vadd.f32 %v2396_v22, %v2392_v9  ;;  %v2378_v37 = vrot.slane %v2377_v23, 2  ;;  %v2409_v38 = vadd.f32 %v2408_v24, %v2394_v11 }
 0x7f8   :  { %v2372_v39 = vrot.slane %v2371_v33, 2  ;;  %v2403_v40 = vadd.f32 %v2402_v34, %v2393_v15  ;;  %v2384_v41 = vrot.slane %v2383_v35, 2  ;;  %v2415_v0 = vadd.f32 %v2414_v32, %v2395_v18 }
 0x7f9   :  { %v2367_v42 = vadd.f32 %v2366_v25, %v2365_v21  ;;  %v2398_v43 = vrot.slane %v2397_v36, 2  ;;  %v2379_v44 = vadd.f32 %v2378_v37, %v2377_v23  ;;  %v2410_v46 = vrot.slane %v2409_v38, 2 }
 0x7fa   :  { %v2373_v48 = vadd.f32 %v2372_v39, %v2371_v33  ;;  %v2404_v50 = vrot.slane %v2403_v40, 2  ;;  %v2385_v54 = vadd.f32 %v2384_v41, %v2383_v35  ;;  %v2416_v47 = vrot.slane %v2415_v0, 2 }
 0x7fb   :  { %v2368_v59 = vrot.slane %v2367_v42, 1  ;;  %v2399_v45 = vadd.f32 %v2398_v43, %v2397_v36  ;;  %v2380_v58 = vrot.slane %v2379_v44, 1  ;;  %v2411_v52 = vadd.f32 %v2410_v46, %v2409_v38 }
 0x7fc   :  { %v2374_v53 = vrot.slane %v2373_v48, 1  ;;  %v2405_v49 = vadd.f32 %v2404_v50, %v2403_v40  ;;  %v2386_v51 = vrot.slane %v2385_v54, 1  ;;  %v2417_v55 = vadd.f32 %v2416_v47, %v2415_v0 }
 0x7fd   :  { %v2369_v56 = vadd.f32 %v2368_v59, %v2367_v42  ;;  %v2400_v57 = vrot.slane %v2399_v45, 1  ;;  %v2381_v60 = vadd.f32 %v2380_v58, %v2379_v44  ;;  %v2412_v62 = vrot.slane %v2411_v52, 1  ;;  %v2432_v44 = vld [vmem:[%s4265_s20] sm:$0xf] }
 0x7fe   :  { %v2375_v63 = vadd.f32 %v2374_v53, %v2373_v48  ;;  %v2406_v2 = vrot.slane %v2405_v49, 1  ;;  %v2387_v3 = vadd.f32 %v2386_v51, %v2385_v54  ;;  %v2418_v4 = vrot.slane %v2417_v55, 1 }
 0x7ff   :  { %v2388_v5 = vmul.f32 0.125, %v2369_v56  ;;  %v2401_v1 = vadd.f32 %v2400_v57, %v2399_v45  ;;  %v2390_v61 = vmul.f32 0.125, %v2381_v60  ;;  %v2413_v8 = vadd.f32 %v2412_v62, %v2411_v52 }
 0x800   :  { %v2389_v9 = vmul.f32 0.125, %v2375_v63  ;;  %v2407_v10 = vadd.f32 %v2406_v2, %v2405_v49  ;;  %v2391_v11 = vmul.f32 0.125, %v2387_v3  ;;  %v2419_v14 = vadd.f32 %v2418_v4, %v2417_v55  ;;  %v2471_v3 = vld [vmem:[%s4266_s21] sm:$0xf] }
 0x801   :  { %v2420_v15 = vmul.f32 0.125, %v2401_v1  ;;  %v2424_v16 = vmul.f32 %v2388_v5, %v2388_v5  ;;  %v2422_v18 = vmul.f32 0.125, %v2413_v8  ;;  %v2426_v19 = vmul.f32 %v2390_v61, %v2390_v61 }
 0x802   :  { %v2421_v20 = vmul.f32 0.125, %v2407_v10  ;;  %v2425_v21 = vmul.f32 %v2389_v9, %v2389_v9  ;;  %v2423_v22 = vmul.f32 0.125, %v2419_v14  ;;  %v2427_v23 = vmul.f32 %v2391_v11, %v2391_v11 }
 0x803   :  { %v2428_v24 = vsub.f32 %v2420_v15, %v2424_v16  ;;  %v2430_v27 = vsub.f32 %v2422_v18, %v2426_v19 }
 0x804   :  { %v2429_v31 = vsub.f32 %v2421_v20, %v2425_v21  ;;  %v2431_v33 = vsub.f32 %v2423_v22, %v2427_v23  ;;  %v3126_v22 = vld [vmem:[%s4294_s26] ss:$0 sm:$0xff] }
 0x805   :  { %v2433_v34 = vadd.f32 1e-05, %v2428_v24  ;;  %v2435_v35 = vadd.f32 1e-05, %v2430_v27 }
 0x806   :  { %v2434_v32 = vadd.f32 1e-05, %v2429_v31  ;;  %v2436_v25 = vadd.f32 1e-05, %v2431_v33 }
 0x807   :  { %3617 = vrsqrt.f32 %v2433_v34 }
 0x808   :  { %3619 = vrsqrt.f32 %v2435_v35 }
 0x809   :  { %3621 = vrsqrt.f32 %v2434_v32 }
 0x80a   :  { %3623 = vrsqrt.f32 %v2436_v25 }
 0x811   :  { %v3618_v36 = vpop.eup %3617 }
 0x812   :  { %v3620_v37 = vpop.eup %3619 }
 0x813   :  { %v3622_v38 = vpop.eup %3621 }
 0x814   :  { %v3624_v39 = vpop.eup %3623  ;;  %v2445_v40 = vcombine.low %v3618_v36, %v3622_v38 }
 0x815   :  { %v2446_v41 = vcombine.low %v3620_v37, %v3624_v39 }
 0x816   :  { %v2453_v0 = vrot.slane %v2445_v40, %v4066_v17 }
 0x817   :  { %v2460_v42 = vrot.slane %v2446_v41, %v4066_v17 }
 0x819   :  { %v2461_v43 = vcombine.low %v2453_v0, %v2460_v42 }
 0x81b   :  { %v2468_v46 = vrot.slane %v2461_v43, %v4066_v17 }
 0x81d   :  { %v2470_v48 = vmul.f32 %v2468_v46, %v2432_v44 }
 0x81f   :  { %v2484_v50 = vrot.slane %v2470_v48, %v4078_v29  ;;  %v2488_v54 = vrot.slane %v2470_v48, %v4080_v30  ;;  %v2476_v47 = vrot.slane %v2470_v48, %v4073_v26  ;;  %v2480_v59 = vrot.slane %v2470_v48, %v4076_v28 }
 0x821   :  { %v2495_v45 = vmul.f32 %v2484_v50, %v2390_v61  ;;  %v2496_v58 = vmul.f32 %v2488_v54, %v2391_v11  ;;  %v2530_v52 = vmul.f32 %v2488_v54, %v4203_v13  ;;  %v2493_v53 = vmul.f32 %v2476_v47, %v2388_v5 }
 0x822   :  { %v2494_v49 = vmul.f32 %v2480_v59, %v2389_v9  ;;  %v2528_v51 = vmul.f32 %v2480_v59, %v4201_v12  ;;  %v2527_v55 = vmul.f32 %v2476_v47, %v4191_v6  ;;  %v2529_v56 = vmul.f32 %v2484_v50, %v4193_v7 }
 0x823   :  { %v2502_v57 = vcombine.low %v2495_v45, %v2496_v58 }
 0x824   :  { %v2501_v60 = vcombine.low %v2493_v53, %v2494_v49 }
 0x825   :  { %v2516_v62 = vrot.slane %v2502_v57, %v4066_v17 }
 0x826   :  { %v2509_v63 = vrot.slane %v2501_v60, %v4066_v17 }
 0x828   :  { %v2517_v2 = vcombine.low %v2509_v63, %v2516_v62 }
 0x82a   :  { %v2524_v13 = vrot.slane %v2517_v2, %v4066_v17 }
 0x82c   :  { %v2526_v4 = vsub.f32 %v2471_v3, %v2524_v13 }
 0x82e   :  { %v2539_v12 = vrot.slane %v2526_v4, %v4076_v28  ;;  %v2547_v6 = vrot.slane %v2526_v4, %v4080_v30  ;;  %v2535_v7 = vrot.slane %v2526_v4, %v4073_v26  ;;  %v2543_v5 = vrot.slane %v2526_v4, %v4078_v29 }
 0x830   :  { %v2553_v1 = vadd.f32 %v2539_v12, %v2528_v51  ;;  %v2555_v61 = vadd.f32 %v2547_v6, %v2530_v52  ;;  %v2552_v8 = vadd.f32 %v2535_v7, %v2527_v55  ;;  %v2554_v9 = vadd.f32 %v2543_v5, %v2529_v56 }
 0x832   :  { %v2557_v10 = vmul.f32 0.01, %v2553_v1  ;;  %v2559_v11 = vmul.f32 0.01, %v2555_v61  ;;  %v2556_v14 = vmul.f32 0.01, %v2552_v8 }
 0x833   :  { %v2558_v15 = vmul.f32 0.01, %v2554_v9 }
 0x834   :  { %v2561_v16 = vmax.f32 %v2553_v1, %v2557_v10  ;;  %v2563_v18 = vmax.f32 %v2555_v61, %v2559_v11  ;;  %v2560_v17 = vmax.f32 %v2552_v8, %v2556_v14 }
 0x835   :  { %v2562_v19 = vmax.f32 %v2554_v9, %v2558_v15 }
 0x836   :  { %v2565_v20 = vpack.c.bf16 %v2561_v16, %v2561_v16  ;;  %v2567_v28 = vpack.c.bf16 %v2563_v18, %v2563_v18  ;;  %v2564_v21 = vpack.c.bf16 %v2560_v17, %v2560_v17 }
 0x837   :  { %v2566_v30 = vpack.c.bf16 %v2562_v19, %v2562_v19 }
 0x838   :  { %2863 = vmatprep.mubr.bf16.mxu0 %v2565_v20  ;;  %2903 = vmatprep.mubr.bf16.mxu1 %v2567_v28 }
 0x839   :  { %2864 = vmatmul.mubr.bf16.vlgmr.msra.gmra.mrb[12].mxu0 %v2564_v21  ;;  %2904 = vmatmul.mubr.bf16.vlgmr.msra.gmra.mrb[24].mxu1 %v2566_v30 }
 0x90c   :  { %v3206_v26 = vpop.f32.mrb[12].mxu0  ;;  %v3228_v29 = vpop.f32.mrb[24].mxu1 }
 0x90d   :  { %v3207_v23 = vpop.f32.mrb[13].mxu0  ;;  %v3229_v24 = vpop.f32.mrb[25].mxu1 }
 0x90e   :  { %v3208_v27 = vadd.f32 %v3207_v23, %v3206_v26  ;;  %v3230_v31 = vadd.f32 %v3229_v24, %v3228_v29  ;;  %v3209_v33 = vpop.f32.mrb[14].mxu0  ;;  %v3231_v34 = vpop.f32.mrb[26].mxu1 }
 0x90f   :  { %v3210_v35 = vpop.f32.mrb[15].mxu0  ;;  %v3232_v32 = vpop.f32.mrb[27].mxu1 }
 0x910   :  { %v2866_v25 = vadd.f32 %v3208_v27, %v3126_v22 }
 0x912   :  { %v2906_v36 = vadd.f32 %v3230_v31, %v2866_v25 }
 0x914   :  { %3625 = vtanh.f32 %v2906_v36 }
 0x91e   :  { %v3626_v37 = vpop.eup %3625 }
 0x91f   :  { %2915 = vst [vmem:[%s4269_s24 + $0x18] sm:$0xff] %v3626_v37 }
 0x920   :  { %2920 = vsyncpa [#allocation3], 1 }
 0x921   :  { %2921 = vsyncpa [#allocation5], 1 }
 0x922   :  { %2922 = vsyncpa [#allocation8], 1 }
 0x923   :  { %2923 = vsyncpa [#allocation11], 1 }

</bundles_post_ra>
